<compile_context>
chip_gen: v6e
topology: v6e:2x2x1
jax: 0.10.0
libtpu: 0.0.40
codegen_flags: <defaults>
</compile_context>

<pallas_src>
import functools
import math

import jax
import jax.numpy as jnp
from jax.experimental import pallas as pl
from jax.experimental.pallas import tpu as pltpu

MIN_STD = 0.01


def latent_encoder_kernel(
    x_ref, y_ref,                 # (TB*Np, x_dim), (TB*Np, y_dim)
    w1x_ref, w1y_ref, b1_ref,     # (x_dim, HP), (y_dim, HP), (1, HP)
    w2_ref, b2_ref,               # (HP, HP), (1, HP)
    w3_ref, b3_ref,               # (HP, HP), (1, HP)
    wp_ref, bp_ref,               # (HP, HP), (1, HP)        penultimate
    wh_ref, bh_ref,               # (HP, OW), (1, OW)        fused [Wm|Wv|Wv]
    out_ref,                      # (1, TB, OW) -> [mean | log_var | sigma | pad]
    *, n_points, n_pad, latent_dim,
):
    rows = x_ref.shape[0]         # TB * n_pad
    tb = rows // n_pad
    hp = w2_ref.shape[0]
    cd = w2_ref.dtype             # matmul-operand dtype (f32 or bf16)

    x2 = x_ref[...]
    y2 = y_ref[...]

    # BatchMLP: Lin+ReLU, Lin+ReLU, Lin.  First layer split across x / y so the
    # wrapper never materializes cat([x, y]) in HBM.  f32 accumulation.
    h = (jnp.dot(x2.astype(cd), w1x_ref[...], preferred_element_type=jnp.float32)
         + jnp.dot(y2.astype(cd), w1y_ref[...], preferred_element_type=jnp.float32)
         + b1_ref[...])
    h = jnp.maximum(h, 0.0)
    h = jnp.dot(h.astype(cd), w2_ref[...],
                preferred_element_type=jnp.float32) + b2_ref[...]
    h = jnp.maximum(h, 0.0)
    h = jnp.dot(h.astype(cd), w3_ref[...],
                preferred_element_type=jnp.float32) + b3_ref[...]

    # Mean over the (real) points of each batch element, in f32.  Padded point
    # rows (zero inputs -> relu(bias) garbage) are masked before the sum.
    if n_pad != n_points:
        row_in_group = jax.lax.broadcasted_iota(jnp.int32, (rows, 1), 0) % n_pad
        h = jnp.where(row_in_group < n_points, h, 0.0)
    # n_pad is a multiple of 8, so this reshape is a free sublane regrouping.
    mean_repr = jnp.sum(h.reshape(tb, n_pad, hp), axis=1) * (1.0 / n_points)

    # Penultimate + ReLU, batched over the whole tile (M = TB).
    m = jnp.dot(mean_repr.astype(cd), wp_ref[...],
                preferred_element_type=jnp.float32) + bp_ref[...]
    m = jnp.maximum(m, 0.0)

    # Fused head: one (TB, HP) @ (HP, OW) matmul.
    # Columns: [mean(L) | log_var(L) | log_var(L) | zero-pad].
    heads = jnp.dot(m.astype(cd), wh_ref[...],
                    preferred_element_type=jnp.float32) + bh_ref[...]
    # use_lvar=False branch of the reference module (sigmoid on EUP, cheap to
    # apply to every lane; only lanes >= 2L are kept).
    sig = MIN_STD + (1.0 - MIN_STD) * jax.nn.sigmoid(0.5 * heads)
    col = jax.lax.broadcasted_iota(jnp.int32, heads.shape, 1)
    # Single contiguous, full-lane-width store of the whole block.
    out_ref[0, :, :] = jnp.where(col >= 2 * latent_dim, sig, heads)


def _round_up(x, m):
    return ((x + m - 1) // m) * m


def _choose_tiling(B, n_pad, target_rows=2048):
    """Batch-tile size TB and number of grid steps (cdiv grid, batch padded)."""
    tb = max(1, target_rows // n_pad)
    # Prefer TB * n_pad to be a multiple of 256 rows (full v6e/v7x MXU passes).
    if tb > 1:
        for cand in range(tb, max(tb // 2, 1) - 1, -1):
            if (cand * n_pad) % 256 == 0:
                tb = cand
                break
    # Keep >= 2 grid steps when B allows: v7x has two TensorCores and the
    # BlockSpec pipeline needs >= 2 steps to overlap the x/y DMA with compute.
    if tb >= B and B > 1:
        tb = pl.cdiv(B, 2)
    tb = max(1, min(tb, B))
    n_steps = pl.cdiv(B, tb)
    return tb, n_steps


def latent_encoder_forward(x, y, params, compute_dtype=jnp.float32,
                           target_rows=2048):
    """x: [B, N, x_dim], y: [B, N, y_dim] -> (mean, sigma, log_var), each [B, L].

    `compute_dtype` sets the dtype of MXU operands (weights / activations fed
    to jnp.dot).  bf16 operands with f32 accumulation are profitable on v5e,
    v6e and v7x alike (halved weight DMA + faster MXU); bias-add, ReLU, mean
    and sigmoid always stay in f32.  Passing x / y already in bf16 additionally
    halves the only per-step HBM traffic.
    """
    B, N, x_dim = x.shape
    y_dim = y.shape[-1]
    H = params["w1"].shape[1]
    L = params["wm"].shape[1]
    cd = compute_dtype

    HP = _round_up(H, 128)            # lane-padded hidden width
    OUT_W = _round_up(3 * L, 128)     # lane-padded [mean|log_var|sigma] width
    N_pad = _round_up(N, 8)           # sublane-aligned points axis (f32 tiles)

    TB, n_steps = _choose_tiling(B, N_pad, target_rows)
    B_pad = n_steps * TB
    TBN = TB * N_pad

    def pad2(a, rows, cols):
        r, c = a.shape
        return jnp.pad(a, ((0, rows - r), (0, cols - c)))

    # Split the first-layer weight (x rows / y rows), lane-pad everything to
    # HP / OUT_W, and fuse the heads as [Wm | Wv | Wv] (the duplicated log_var
    # columns feed the in-kernel sigma select).  Zero padding never changes
    # the real output lanes.
    w1x = pad2(params["w1"][:x_dim], x_dim, HP).astype(cd)
    w1y = pad2(params["w1"][x_dim:], y_dim, HP).astype(cd)
    w2 = pad2(params["w2"], HP, HP).astype(cd)
    w3 = pad2(params["w3"], HP, HP).astype(cd)
    wp = pad2(params["wp"], HP, HP).astype(cd)
    wh = pad2(jnp.concatenate([params["wm"], params["wv"], params["wv"]],
                              axis=1), HP, OUT_W).astype(cd)
    b1 = pad2(params["b1"], 1, HP).astype(jnp.float32)
    b2 = pad2(params["b2"], 1, HP).astype(jnp.float32)
    b3 = pad2(params["b3"], 1, HP).astype(jnp.float32)
    bp = pad2(params["bp"], 1, HP).astype(jnp.float32)
    bh = pad2(jnp.concatenate([params["bm"], params["bv"], params["bv"]],
                              axis=1), 1, OUT_W).astype(jnp.float32)

    # Flatten (and zero-pad) x / y in the wrapper: a free HBM-side reshape, so
    # the kernel loads (TB*N_pad, d) slabs already in their final layout.
    x_p = jnp.pad(x, ((0, B_pad - B), (0, N_pad - N), (0, 0)))
    y_p = jnp.pad(y, ((0, B_pad - B), (0, N_pad - N), (0, 0)))
    x_flat = x_p.reshape(B_pad * N_pad, x_dim)
    y_flat = y_p.reshape(B_pad * N_pad, y_dim)

    # Explicit VMEM budget from the actual buffers (weights counted
    # double-buffered to stay conservative even when Buffered(1) is honored).
    def nbytes(a):
        return a.size * a.dtype.itemsize

    weight_bytes = sum(nbytes(a) for a in (w1x, w1y, w2, w3, wp, wh,
                                           b1, b2, b3, bp, bh))
    io_bytes = 2 * (TBN * x_dim * x_flat.dtype.itemsize
                    + TBN * y_dim * y_flat.dtype.itemsize
                    + TB * OUT_W * 4)
    act_bytes = 4 * TBN * HP * 4
    need = 2 * weight_bytes + io_bytes + act_bytes + (4 << 20)
    vmem_limit = int(min(max(need, 32 << 20), 64 << 20))

    kern = functools.partial(latent_encoder_kernel,
                             n_points=N, n_pad=N_pad, latent_dim=L)

    def run(use_buffered_weights):
        const_kwargs = (dict(pipeline_mode=pl.Buffered(1))
                        if use_buffered_weights else {})

        def wspec(shape):
            # Grid-invariant weight/bias block: same tile every step.
            return pl.BlockSpec(shape, lambda b: (0, 0), **const_kwargs)

        in_specs = [
            pl.BlockSpec((TBN, x_dim), lambda b: (b, 0)),   # x batch tile
            pl.BlockSpec((TBN, y_dim), lambda b: (b, 0)),   # y batch tile
            wspec((x_dim, HP)), wspec((y_dim, HP)), wspec((1, HP)),
            wspec((HP, HP)), wspec((1, HP)),
            wspec((HP, HP)), wspec((1, HP)),
            wspec((HP, HP)), wspec((1, HP)),
            wspec((HP, OUT_W)), wspec((1, OUT_W)),
        ]
        out_spec = pl.BlockSpec((1, TB, OUT_W), lambda b: (b, 0, 0))
        out_shape = jax.ShapeDtypeStruct((n_steps, TB, OUT_W), jnp.float32)

        return pl.pallas_call(
            kern,
            grid=(n_steps,),
            in_specs=in_specs,
            out_specs=out_spec,
            out_shape=out_shape,
            compiler_params=pltpu.CompilerParams(
                dimension_semantics=("parallel",),
                vmem_limit_bytes=vmem_limit),
        )(x_flat, y_flat, w1x, w1y, b1, w2, b2, w3, b3, wp, bp, wh, bh)

    try:
        out3 = run(True)
    except Exception:
        # This JAX version rejects single-buffered invariant blocks
        # (pipeline_mode=pl.Buffered(1)); fall back to default buffering.
        out3 = run(False)

    out = out3.reshape(B_pad, OUT_W)[:B]
    mean = out[:, :L]
    log_var = out[:, L:2 * L]
    sigma = out[:, 2 * L:3 * L]
    return mean, sigma, log_var


def init_params(key, input_dim, hidden_dim, latent_dim):
    """Deterministic synthetic init. Weights stored [in, out]; biases [1, out]."""
    ks = jax.random.split(key, 12)

    def lin(kw, kb, fan_in, fan_out):
        bound = 1.0 / jnp.sqrt(fan_in)
        w = jax.random.uniform(kw, (fan_in, fan_out), jnp.float32, -bound, bound)
        b = jax.random.uniform(kb, (1, fan_out), jnp.float32, -bound, bound)
        return w, b

    w1, b1 = lin(ks[0], ks[1], input_dim, hidden_dim)
    w2, b2 = lin(ks[2], ks[3], hidden_dim, hidden_dim)
    w3, b3 = lin(ks[4], ks[5], hidden_dim, hidden_dim)
    wp, bp = lin(ks[6], ks[7], hidden_dim, hidden_dim)
    wm, bm = lin(ks[8], ks[9], hidden_dim, latent_dim)
    wv, bv = lin(ks[10], ks[11], hidden_dim, latent_dim)
    return dict(w1=w1, b1=b1, w2=w2, b2=b2, w3=w3, b3=b3,
                wp=wp, bp=bp, wm=wm, bm=bm, wv=wv, bv=bv)


def reference_forward(x, y, params):
    """Pure-JAX reference for validation."""
    h = jnp.concatenate([x, y], axis=-1)
    h = jnp.maximum(h @ params["w1"] + params["b1"], 0.0)
    h = jnp.maximum(h @ params["w2"] + params["b2"], 0.0)
    h = h @ params["w3"] + params["b3"]
    m = jnp.mean(h, axis=1)
    m = jnp.maximum(m @ params["wp"] + params["bp"], 0.0)
    mean = m @ params["wm"] + params["bm"]
    log_var = m @ params["wv"] + params["bv"]
    sigma = MIN_STD + (1.0 - MIN_STD) * jax.nn.sigmoid(0.5 * log_var)
    return mean, sigma, log_var


if __name__ == "__main__":
    B, N = 2, 8
    x_dim, y_dim = 3, 1
    hidden_dim, latent_dim = 32, 32
    input_dim = x_dim + y_dim

    key = jax.random.PRNGKey(0)
    kx, ky, kp = jax.random.split(key, 3)
    x = jax.random.normal(kx, (B, N, x_dim), jnp.float32)
    y = jax.random.normal(ky, (B, N, y_dim), jnp.float32)
    params = init_params(kp, input_dim, hidden_dim, latent_dim)

    r_mean, r_sigma, r_lv = reference_forward(x, y, params)

    # f32 path: tight check against the pure-JAX reference.
    mean, sigma, log_var = latent_encoder_forward(x, y, params)
    jax.block_until_ready((mean, sigma, log_var))
    assert mean.shape == (B, latent_dim) and sigma.shape == (B, latent_dim)
    assert jnp.allclose(mean, r_mean, atol=1e-5), "mean mismatch"
    assert jnp.allclose(sigma, r_sigma, atol=1e-5), "sigma mismatch"
    assert jnp.allclose(log_var, r_lv, atol=1e-5), "log_var mismatch"

    # bf16-operand path (bf16 x/y halves the per-step DMA too): loose-tolerance
    # check against the f32 reference so bf16 regressions are caught.
    bmean, bsigma, blv = latent_encoder_forward(
        x.astype(jnp.bfloat16), y.astype(jnp.bfloat16), params,
        compute_dtype=jnp.bfloat16)
    jax.block_until_ready((bmean, bsigma, blv))
    assert bool(jnp.all(jnp.isfinite(bmean)) & jnp.all(jnp.isfinite(bsigma)))
    assert jnp.allclose(bmean, r_mean, atol=5e-2), "bf16 mean drift"
    assert jnp.allclose(bsigma, r_sigma, atol=5e-2), "bf16 sigma drift"
    assert jnp.allclose(blv, r_lv, atol=5e-2), "bf16 log_var drift"

    # TODO(synk): torch.distributions.Normal has no Pallas equivalent; the
    # distribution parameters (mean, sigma) and log_var are returned instead.
    print("KERNEL_OK")
</pallas_src>

<mosaic_0001>
module attributes {stable_mosaic.version = 11 : i64} {
  func.func @latent_encoder_kernel(%arg0: i32, %arg1: memref<8x3xf32, #tpu.memory_space<vmem>>, %arg2: memref<8x1xf32, #tpu.memory_space<vmem>>, %arg3: memref<3x128xf32, #tpu.memory_space<vmem>>, %arg4: memref<1x128xf32, #tpu.memory_space<vmem>>, %arg5: memref<1x128xf32, #tpu.memory_space<vmem>>, %arg6: memref<128x128xf32, #tpu.memory_space<vmem>>, %arg7: memref<1x128xf32, #tpu.memory_space<vmem>>, %arg8: memref<128x128xf32, #tpu.memory_space<vmem>>, %arg9: memref<1x128xf32, #tpu.memory_space<vmem>>, %arg10: memref<128x128xf32, #tpu.memory_space<vmem>>, %arg11: memref<1x128xf32, #tpu.memory_space<vmem>>, %arg12: memref<128x128xf32, #tpu.memory_space<vmem>>, %arg13: memref<1x128xf32, #tpu.memory_space<vmem>>, %arg14: memref<1x1x128xf32, #tpu.memory_space<vmem>>) attributes {dimension_semantics = [#tpu.dimension_semantics<parallel>], iteration_bounds = array<i64: 2>, scalar_prefetch = 0 : i64, scratch_operands = 0 : i64, tpu.core_type = #tpu.core_type<tc>, window_params = [{transform_indices = @transform_0, window_bounds = array<i64: 8, 3>}, {transform_indices = @transform_1, window_bounds = array<i64: 8, 1>}, {pipeline_mode = #tpu.pipeline_mode<synchronous>, transform_indices = @transform_2, window_bounds = array<i64: 3, 128>}, {pipeline_mode = #tpu.pipeline_mode<synchronous>, transform_indices = @transform_3, window_bounds = array<i64: 1, 128>}, {pipeline_mode = #tpu.pipeline_mode<synchronous>, transform_indices = @transform_4, window_bounds = array<i64: 1, 128>}, {pipeline_mode = #tpu.pipeline_mode<synchronous>, transform_indices = @transform_5, window_bounds = array<i64: 128, 128>}, {pipeline_mode = #tpu.pipeline_mode<synchronous>, transform_indices = @transform_6, window_bounds = array<i64: 1, 128>}, {pipeline_mode = #tpu.pipeline_mode<synchronous>, transform_indices = @transform_7, window_bounds = array<i64: 128, 128>}, {pipeline_mode = #tpu.pipeline_mode<synchronous>, transform_indices = @transform_8, window_bounds = array<i64: 1, 128>}, {pipeline_mode = #tpu.pipeline_mode<synchronous>, transform_indices = @transform_9, window_bounds = array<i64: 128, 128>}, {pipeline_mode = #tpu.pipeline_mode<synchronous>, transform_indices = @transform_10, window_bounds = array<i64: 1, 128>}, {pipeline_mode = #tpu.pipeline_mode<synchronous>, transform_indices = @transform_11, window_bounds = array<i64: 128, 128>}, {pipeline_mode = #tpu.pipeline_mode<synchronous>, transform_indices = @transform_12, window_bounds = array<i64: 1, 128>}, {transform_indices = @transform_13, window_bounds = array<i64: 1, 1, 128>}]} {
    %c0 = arith.constant 0 : index
    %c0_0 = arith.constant 0 : index
    %0 = vector.load %arg1[%c0, %c0_0] : memref<8x3xf32, #tpu.memory_space<vmem>>, vector<8x3xf32>
    %c0_1 = arith.constant 0 : index
    %c0_2 = arith.constant 0 : index
    %1 = vector.load %arg2[%c0_1, %c0_2] : memref<8x1xf32, #tpu.memory_space<vmem>>, vector<8x1xf32>
    %c0_3 = arith.constant 0 : index
    %c0_4 = arith.constant 0 : index
    %2 = vector.load %arg3[%c0_3, %c0_4] : memref<3x128xf32, #tpu.memory_space<vmem>>, vector<3x128xf32>
    %cst = arith.constant dense<0.000000e+00> : vector<8x128xf32>
    %3 = tpu.matmul %0, %2, %cst {dimension_numbers = #tpu.dot_dimension_numbers<[1], [0], [0], [1], [0, 0, 1, 1], [], []>} : vector<8x3xf32>, vector<3x128xf32>, vector<8x128xf32> -> vector<8x128xf32>
    %c0_5 = arith.constant 0 : index
    %c0_6 = arith.constant 0 : index
    %4 = vector.load %arg4[%c0_5, %c0_6] : memref<1x128xf32, #tpu.memory_space<vmem>>, vector<1x128xf32>
    %cst_7 = arith.constant dense<0.000000e+00> : vector<8x128xf32>
    %5 = tpu.matmul %1, %4, %cst_7 {dimension_numbers = #tpu.dot_dimension_numbers<[1], [0], [0], [1], [0, 0, 1, 1], [], []>} : vector<8x1xf32>, vector<1x128xf32>, vector<8x128xf32> -> vector<8x128xf32>
    %6 = arith.addf %3, %5 : vector<8x128xf32>
    %c0_8 = arith.constant 0 : index
    %c0_9 = arith.constant 0 : index
    %7 = vector.load %arg5[%c0_8, %c0_9] : memref<1x128xf32, #tpu.memory_space<vmem>>, vector<1x128xf32>
    %8 = vector.broadcast %7 : vector<1x128xf32> to vector<8x128xf32>
    %9 = arith.addf %6, %8 : vector<8x128xf32>
    %cst_10 = arith.constant 0.000000e+00 : f32
    %10 = vector.broadcast %cst_10 : f32 to vector<8x128xf32>
    %11 = arith.maximumf %9, %10 : vector<8x128xf32>
    %c0_11 = arith.constant 0 : index
    %c0_12 = arith.constant 0 : index
    %12 = vector.load %arg6[%c0_11, %c0_12] : memref<128x128xf32, #tpu.memory_space<vmem>>, vector<128x128xf32>
    %cst_13 = arith.constant dense<0.000000e+00> : vector<8x128xf32>
    %13 = tpu.matmul %11, %12, %cst_13 {dimension_numbers = #tpu.dot_dimension_numbers<[1], [0], [0], [1], [0, 0, 1, 1], [], []>} : vector<8x128xf32>, vector<128x128xf32>, vector<8x128xf32> -> vector<8x128xf32>
    %c0_14 = arith.constant 0 : index
    %c0_15 = arith.constant 0 : index
    %14 = vector.load %arg7[%c0_14, %c0_15] : memref<1x128xf32, #tpu.memory_space<vmem>>, vector<1x128xf32>
    %15 = vector.broadcast %14 : vector<1x128xf32> to vector<8x128xf32>
    %16 = arith.addf %13, %15 : vector<8x128xf32>
    %cst_16 = arith.constant 0.000000e+00 : f32
    %17 = vector.broadcast %cst_16 : f32 to vector<8x128xf32>
    %18 = arith.maximumf %16, %17 : vector<8x128xf32>
    %c0_17 = arith.constant 0 : index
    %c0_18 = arith.constant 0 : index
    %19 = vector.load %arg8[%c0_17, %c0_18] : memref<128x128xf32, #tpu.memory_space<vmem>>, vector<128x128xf32>
    %cst_19 = arith.constant dense<0.000000e+00> : vector<8x128xf32>
    %20 = tpu.matmul %18, %19, %cst_19 {dimension_numbers = #tpu.dot_dimension_numbers<[1], [0], [0], [1], [0, 0, 1, 1], [], []>} : vector<8x128xf32>, vector<128x128xf32>, vector<8x128xf32> -> vector<8x128xf32>
    %c0_20 = arith.constant 0 : index
    %c0_21 = arith.constant 0 : index
    %21 = vector.load %arg9[%c0_20, %c0_21] : memref<1x128xf32, #tpu.memory_space<vmem>>, vector<1x128xf32>
    %22 = vector.broadcast %21 : vector<1x128xf32> to vector<8x128xf32>
    %23 = arith.addf %20, %22 : vector<8x128xf32>
    %24 = vector.shape_cast %23 : vector<8x128xf32> to vector<1x8x128xf32>
    %cst_22 = arith.constant dense<0.000000e+00> : vector<1x128xf32>
    %25 = vector.multi_reduction <add>, %24, %cst_22 [1] : vector<1x8x128xf32> to vector<1x128xf32>
    %cst_23 = arith.constant 1.250000e-01 : f32
    %26 = vector.broadcast %cst_23 : f32 to vector<1x128xf32>
    %27 = arith.mulf %25, %26 : vector<1x128xf32>
    %c0_24 = arith.constant 0 : index
    %c0_25 = arith.constant 0 : index
    %28 = vector.load %arg10[%c0_24, %c0_25] : memref<128x128xf32, #tpu.memory_space<vmem>>, vector<128x128xf32>
    %cst_26 = arith.constant dense<0.000000e+00> : vector<1x128xf32>
    %29 = tpu.matmul %27, %28, %cst_26 {dimension_numbers = #tpu.dot_dimension_numbers<[1], [0], [0], [1], [0, 0, 1, 1], [], []>} : vector<1x128xf32>, vector<128x128xf32>, vector<1x128xf32> -> vector<1x128xf32>
    %c0_27 = arith.constant 0 : index
    %c0_28 = arith.constant 0 : index
    %30 = vector.load %arg11[%c0_27, %c0_28] : memref<1x128xf32, #tpu.memory_space<vmem>>, vector<1x128xf32>
    %31 = arith.addf %29, %30 : vector<1x128xf32>
    %cst_29 = arith.constant 0.000000e+00 : f32
    %32 = vector.broadcast %cst_29 : f32 to vector<1x128xf32>
    %33 = arith.maximumf %31, %32 : vector<1x128xf32>
    %c0_30 = arith.constant 0 : index
    %c0_31 = arith.constant 0 : index
    %34 = vector.load %arg12[%c0_30, %c0_31] : memref<128x128xf32, #tpu.memory_space<vmem>>, vector<128x128xf32>
    %cst_32 = arith.constant dense<0.000000e+00> : vector<1x128xf32>
    %35 = tpu.matmul %33, %34, %cst_32 {dimension_numbers = #tpu.dot_dimension_numbers<[1], [0], [0], [1], [0, 0, 1, 1], [], []>} : vector<1x128xf32>, vector<128x128xf32>, vector<1x128xf32> -> vector<1x128xf32>
    %c0_33 = arith.constant 0 : index
    %c0_34 = arith.constant 0 : index
    %36 = vector.load %arg13[%c0_33, %c0_34] : memref<1x128xf32, #tpu.memory_space<vmem>>, vector<1x128xf32>
    %37 = arith.addf %35, %36 : vector<1x128xf32>
    %cst_35 = arith.constant 5.000000e-01 : f32
    %38 = vector.broadcast %cst_35 : f32 to vector<1x128xf32>
    %39 = arith.mulf %38, %37 : vector<1x128xf32>
    %40 = arith.negf %39 : vector<1x128xf32>
    %41 = math.exp %40 : vector<1x128xf32>
    %cst_36 = arith.constant 1.000000e+00 : f32
    %42 = vector.broadcast %cst_36 : f32 to vector<1x128xf32>
    %43 = arith.addf %42, %41 : vector<1x128xf32>
    %44 = arith.divf %42, %43 : vector<1x128xf32>
    %cst_37 = arith.constant 9.900000e-01 : f32
    %45 = vector.broadcast %cst_37 : f32 to vector<1x128xf32>
    %46 = arith.mulf %45, %44 : vector<1x128xf32>
    %cst_38 = arith.constant 0.00999999977 : f32
    %47 = vector.broadcast %cst_38 : f32 to vector<1x128xf32>
    %48 = arith.addf %47, %46 : vector<1x128xf32>
    %49 = tpu.iota {dimensions = array<i32: 1>} : vector<1x128xi32>
    %c64_i32 = arith.constant 64 : i32
    %50 = vector.broadcast %c64_i32 : i32 to vector<1x128xi32>
    %51 = arith.cmpi sge, %49, %50 : vector<1x128xi32>
    %52 = arith.select %51, %48, %37 : vector<1x128xi1>, vector<1x128xf32>
    %c0_39 = arith.constant 0 : index
    %c0_40 = arith.constant 0 : index
    %c0_41 = arith.constant 0 : index
    %53 = vector.load %arg14[%c0_39, %c0_40, %c0_41] : memref<1x1x128xf32, #tpu.memory_space<vmem>>, vector<1x1x128xf32>
    %54 = vector.shape_cast %53 : vector<1x1x128xf32> to vector<1x128xf32>
    %55 = vector.shape_cast %52 : vector<1x128xf32> to vector<1x1x128xf32>
    tpu.vector_store %arg14[%c0_39, %c0_40, %c0_41], %55 {strides = array<i32>} : memref<1x1x128xf32, #tpu.memory_space<vmem>>, vector<1x1x128xf32>,
    return
  }
  func.func @transform_0(%arg0: i32) -> (i32, i32) {
    %c0_i32 = arith.constant 0 : i32
    %c0_i32_0 = arith.constant 0 : i32
    return %arg0, %c0_i32 : i32, i32
  }
  func.func @transform_1(%arg0: i32) -> (i32, i32) {
    %c0_i32 = arith.constant 0 : i32
    %c0_i32_0 = arith.constant 0 : i32
    return %arg0, %c0_i32 : i32, i32
  }
  func.func @transform_2(%arg0: i32) -> (i32, i32) {
    %c0_i32 = arith.constant 0 : i32
    %c0_i32_0 = arith.constant 0 : i32
    %c0_i32_1 = arith.constant 0 : i32
    return %c0_i32, %c0_i32_0 : i32, i32
  }
  func.func @transform_3(%arg0: i32) -> (i32, i32) {
    %c0_i32 = arith.constant 0 : i32
    %c0_i32_0 = arith.constant 0 : i32
    %c0_i32_1 = arith.constant 0 : i32
    return %c0_i32, %c0_i32_0 : i32, i32
  }
  func.func @transform_4(%arg0: i32) -> (i32, i32) {
    %c0_i32 = arith.constant 0 : i32
    %c0_i32_0 = arith.constant 0 : i32
    %c0_i32_1 = arith.constant 0 : i32
    return %c0_i32, %c0_i32_0 : i32, i32
  }
  func.func @transform_5(%arg0: i32) -> (i32, i32) {
    %c0_i32 = arith.constant 0 : i32
    %c0_i32_0 = arith.constant 0 : i32
    %c0_i32_1 = arith.constant 0 : i32
    return %c0_i32, %c0_i32_0 : i32, i32
  }
  func.func @transform_6(%arg0: i32) -> (i32, i32) {
    %c0_i32 = arith.constant 0 : i32
    %c0_i32_0 = arith.constant 0 : i32
    %c0_i32_1 = arith.constant 0 : i32
    return %c0_i32, %c0_i32_0 : i32, i32
  }
  func.func @transform_7(%arg0: i32) -> (i32, i32) {
    %c0_i32 = arith.constant 0 : i32
    %c0_i32_0 = arith.constant 0 : i32
    %c0_i32_1 = arith.constant 0 : i32
    return %c0_i32, %c0_i32_0 : i32, i32
  }
  func.func @transform_8(%arg0: i32) -> (i32, i32) {
    %c0_i32 = arith.constant 0 : i32
    %c0_i32_0 = arith.constant 0 : i32
    %c0_i32_1 = arith.constant 0 : i32
    return %c0_i32, %c0_i32_0 : i32, i32
  }
  func.func @transform_9(%arg0: i32) -> (i32, i32) {
    %c0_i32 = arith.constant 0 : i32
    %c0_i32_0 = arith.constant 0 : i32
    %c0_i32_1 = arith.constant 0 : i32
    return %c0_i32, %c0_i32_0 : i32, i32
  }
  func.func @transform_10(%arg0: i32) -> (i32, i32) {
    %c0_i32 = arith.constant 0 : i32
    %c0_i32_0 = arith.constant 0 : i32
    %c0_i32_1 = arith.constant 0 : i32
    return %c0_i32, %c0_i32_0 : i32, i32
  }
  func.func @transform_11(%arg0: i32) -> (i32, i32) {
    %c0_i32 = arith.constant 0 : i32
    %c0_i32_0 = arith.constant 0 : i32
    %c0_i32_1 = arith.constant 0 : i32
    return %c0_i32, %c0_i32_0 : i32, i32
  }
  func.func @transform_12(%arg0: i32) -> (i32, i32) {
    %c0_i32 = arith.constant 0 : i32
    %c0_i32_0 = arith.constant 0 : i32
    %c0_i32_1 = arith.constant 0 : i32
    return %c0_i32, %c0_i32_0 : i32, i32
  }
  func.func @transform_13(%arg0: i32) -> (i32, i32, i32) {
    %c0_i32 = arith.constant 0 : i32
    %c0_i32_0 = arith.constant 0 : i32
    %c0_i32_1 = arith.constant 0 : i32
    return %arg0, %c0_i32, %c0_i32_0 : i32, i32, i32
  }
}

module attributes {stable_mosaic.version = 11 : i64} {
  func.func @latent_encoder_kernel(%arg0: i32, %arg1: memref<8x3xf32, #tpu.memory_space<vmem>>, %arg2: memref<8x1xf32, #tpu.memory_space<vmem>>, %arg3: memref<3x128xf32, #tpu.memory_space<vmem>>, %arg4: memref<1x128xf32, #tpu.memory_space<vmem>>, %arg5: memref<1x128xf32, #tpu.memory_space<vmem>>, %arg6: memref<128x128xf32, #tpu.memory_space<vmem>>, %arg7: memref<1x128xf32, #tpu.memory_space<vmem>>, %arg8: memref<128x128xf32, #tpu.memory_space<vmem>>, %arg9: memref<1x128xf32, #tpu.memory_space<vmem>>, %arg10: memref<128x128xf32, #tpu.memory_space<vmem>>, %arg11: memref<1x128xf32, #tpu.memory_space<vmem>>, %arg12: memref<128x128xf32, #tpu.memory_space<vmem>>, %arg13: memref<1x128xf32, #tpu.memory_space<vmem>>, %arg14: memref<1x1x128xf32, #tpu.memory_space<vmem>>) attributes {dimension_semantics = [#tpu.dimension_semantics<parallel>], iteration_bounds = array<i64: 2>, scalar_prefetch = 0 : i64, scratch_operands = 0 : i64, tpu.core_type = #tpu.core_type<tc>, window_params = [{transform_indices = @transform_0, window_bounds = array<i64: 8, 3>}, {transform_indices = @transform_1, window_bounds = array<i64: 8, 1>}, {pipeline_mode = #tpu.pipeline_mode<synchronous>, transform_indices = @transform_2, window_bounds = array<i64: 3, 128>}, {pipeline_mode = #tpu.pipeline_mode<synchronous>, transform_indices = @transform_3, window_bounds = array<i64: 1, 128>}, {pipeline_mode = #tpu.pipeline_mode<synchronous>, transform_indices = @transform_4, window_bounds = array<i64: 1, 128>}, {pipeline_mode = #tpu.pipeline_mode<synchronous>, transform_indices = @transform_5, window_bounds = array<i64: 128, 128>}, {pipeline_mode = #tpu.pipeline_mode<synchronous>, transform_indices = @transform_6, window_bounds = array<i64: 1, 128>}, {pipeline_mode = #tpu.pipeline_mode<synchronous>, transform_indices = @transform_7, window_bounds = array<i64: 128, 128>}, {pipeline_mode = #tpu.pipeline_mode<synchronous>, transform_indices = @transform_8, window_bounds = array<i64: 1, 128>}, {pipeline_mode = #tpu.pipeline_mode<synchronous>, transform_indices = @transform_9, window_bounds = array<i64: 128, 128>}, {pipeline_mode = #tpu.pipeline_mode<synchronous>, transform_indices = @transform_10, window_bounds = array<i64: 1, 128>}, {pipeline_mode = #tpu.pipeline_mode<synchronous>, transform_indices = @transform_11, window_bounds = array<i64: 128, 128>}, {pipeline_mode = #tpu.pipeline_mode<synchronous>, transform_indices = @transform_12, window_bounds = array<i64: 1, 128>}, {transform_indices = @transform_13, window_bounds = array<i64: 1, 1, 128>}]} {
    %c0 = arith.constant 0 : index
    %c0_0 = arith.constant 0 : index
    %0 = vector.load %arg1[%c0, %c0_0] : memref<8x3xf32, #tpu.memory_space<vmem>>, vector<8x3xf32>
    %c0_1 = arith.constant 0 : index
    %c0_2 = arith.constant 0 : index
    %1 = vector.load %arg2[%c0_1, %c0_2] : memref<8x1xf32, #tpu.memory_space<vmem>>, vector<8x1xf32>
    %c0_3 = arith.constant 0 : index
    %c0_4 = arith.constant 0 : index
    %2 = vector.load %arg3[%c0_3, %c0_4] : memref<3x128xf32, #tpu.memory_space<vmem>>, vector<3x128xf32>
    %cst = arith.constant dense<0.000000e+00> : vector<8x128xf32>
    %3 = tpu.matmul %0, %2, %cst {dimension_numbers = #tpu.dot_dimension_numbers<[1], [0], [0], [1], [0, 0, 1, 1], [], []>} : vector<8x3xf32>, vector<3x128xf32>, vector<8x128xf32> -> vector<8x128xf32>
    %c0_5 = arith.constant 0 : index
    %c0_6 = arith.constant 0 : index
    %4 = vector.load %arg4[%c0_5, %c0_6] : memref<1x128xf32, #tpu.memory_space<vmem>>, vector<1x128xf32>
    %cst_7 = arith.constant dense<0.000000e+00> : vector<8x128xf32>
    %5 = tpu.matmul %1, %4, %cst_7 {dimension_numbers = #tpu.dot_dimension_numbers<[1], [0], [0], [1], [0, 0, 1, 1], [], []>} : vector<8x1xf32>, vector<1x128xf32>, vector<8x128xf32> -> vector<8x128xf32>
    %6 = arith.addf %3, %5 : vector<8x128xf32>
    %c0_8 = arith.constant 0 : index
    %c0_9 = arith.constant 0 : index
    %7 = vector.load %arg5[%c0_8, %c0_9] : memref<1x128xf32, #tpu.memory_space<vmem>>, vector<1x128xf32>
    %8 = vector.broadcast %7 : vector<1x128xf32> to vector<8x128xf32>
    %9 = arith.addf %6, %8 : vector<8x128xf32>
    %cst_10 = arith.constant 0.000000e+00 : f32
    %10 = vector.broadcast %cst_10 : f32 to vector<8x128xf32>
    %11 = arith.maximumf %9, %10 : vector<8x128xf32>
    %c0_11 = arith.constant 0 : index
    %c0_12 = arith.constant 0 : index
    %12 = vector.load %arg6[%c0_11, %c0_12] : memref<128x128xf32, #tpu.memory_space<vmem>>, vector<128x128xf32>
    %cst_13 = arith.constant dense<0.000000e+00> : vector<8x128xf32>
    %13 = tpu.matmul %11, %12, %cst_13 {dimension_numbers = #tpu.dot_dimension_numbers<[1], [0], [0], [1], [0, 0, 1, 1], [], []>} : vector<8x128xf32>, vector<128x128xf32>, vector<8x128xf32> -> vector<8x128xf32>
    %c0_14 = arith.constant 0 : index
    %c0_15 = arith.constant 0 : index
    %14 = vector.load %arg7[%c0_14, %c0_15] : memref<1x128xf32, #tpu.memory_space<vmem>>, vector<1x128xf32>
    %15 = vector.broadcast %14 : vector<1x128xf32> to vector<8x128xf32>
    %16 = arith.addf %13, %15 : vector<8x128xf32>
    %cst_16 = arith.constant 0.000000e+00 : f32
    %17 = vector.broadcast %cst_16 : f32 to vector<8x128xf32>
    %18 = arith.maximumf %16, %17 : vector<8x128xf32>
    %c0_17 = arith.constant 0 : index
    %c0_18 = arith.constant 0 : index
    %19 = vector.load %arg8[%c0_17, %c0_18] : memref<128x128xf32, #tpu.memory_space<vmem>>, vector<128x128xf32>
    %cst_19 = arith.constant dense<0.000000e+00> : vector<8x128xf32>
    %20 = tpu.matmul %18, %19, %cst_19 {dimension_numbers = #tpu.dot_dimension_numbers<[1], [0], [0], [1], [0, 0, 1, 1], [], []>} : vector<8x128xf32>, vector<128x128xf32>, vector<8x128xf32> -> vector<8x128xf32>
    %c0_20 = arith.constant 0 : index
    %c0_21 = arith.constant 0 : index
    %21 = vector.load %arg9[%c0_20, %c0_21] : memref<1x128xf32, #tpu.memory_space<vmem>>, vector<1x128xf32>
    %22 = vector.broadcast %21 : vector<1x128xf32> to vector<8x128xf32>
    %23 = arith.addf %20, %22 : vector<8x128xf32>
    %24 = vector.shape_cast %23 : vector<8x128xf32> to vector<1x8x128xf32>
    %cst_22 = arith.constant dense<0.000000e+00> : vector<1x128xf32>
    %25 = vector.multi_reduction <add>, %24, %cst_22 [1] : vector<1x8x128xf32> to vector<1x128xf32>
    %cst_23 = arith.constant 1.250000e-01 : f32
    %26 = vector.broadcast %cst_23 : f32 to vector<1x128xf32>
    %27 = arith.mulf %25, %26 : vector<1x128xf32>
    %c0_24 = arith.constant 0 : index
    %c0_25 = arith.constant 0 : index
    %28 = vector.load %arg10[%c0_24, %c0_25] : memref<128x128xf32, #tpu.memory_space<vmem>>, vector<128x128xf32>
    %cst_26 = arith.constant dense<0.000000e+00> : vector<1x128xf32>
    %29 = tpu.matmul %27, %28, %cst_26 {dimension_numbers = #tpu.dot_dimension_numbers<[1], [0], [0], [1], [0, 0, 1, 1], [], []>} : vector<1x128xf32>, vector<128x128xf32>, vector<1x128xf32> -> vector<1x128xf32>
    %c0_27 = arith.constant 0 : index
    %c0_28 = arith.constant 0 : index
    %30 = vector.load %arg11[%c0_27, %c0_28] : memref<1x128xf32, #tpu.memory_space<vmem>>, vector<1x128xf32>
    %31 = arith.addf %29, %30 : vector<1x128xf32>
    %cst_29 = arith.constant 0.000000e+00 : f32
    %32 = vector.broadcast %cst_29 : f32 to vector<1x128xf32>
    %33 = arith.maximumf %31, %32 : vector<1x128xf32>
    %c0_30 = arith.constant 0 : index
    %c0_31 = arith.constant 0 : index
    %34 = vector.load %arg12[%c0_30, %c0_31] : memref<128x128xf32, #tpu.memory_space<vmem>>, vector<128x128xf32>
    %cst_32 = arith.constant dense<0.000000e+00> : vector<1x128xf32>
    %35 = tpu.matmul %33, %34, %cst_32 {dimension_numbers = #tpu.dot_dimension_numbers<[1], [0], [0], [1], [0, 0, 1, 1], [], []>} : vector<1x128xf32>, vector<128x128xf32>, vector<1x128xf32> -> vector<1x128xf32>
    %c0_33 = arith.constant 0 : index
    %c0_34 = arith.constant 0 : index
    %36 = vector.load %arg13[%c0_33, %c0_34] : memref<1x128xf32, #tpu.memory_space<vmem>>, vector<1x128xf32>
    %37 = arith.addf %35, %36 : vector<1x128xf32>
    %cst_35 = arith.constant 5.000000e-01 : f32
    %38 = vector.broadcast %cst_35 : f32 to vector<1x128xf32>
    %39 = arith.mulf %38, %37 : vector<1x128xf32>
    %40 = arith.negf %39 : vector<1x128xf32>
    %41 = math.exp %40 : vector<1x128xf32>
    %cst_36 = arith.constant 1.000000e+00 : f32
    %42 = vector.broadcast %cst_36 : f32 to vector<1x128xf32>
    %43 = arith.addf %42, %41 : vector<1x128xf32>
    %44 = arith.divf %42, %43 : vector<1x128xf32>
    %cst_37 = arith.constant 9.900000e-01 : f32
    %45 = vector.broadcast %cst_37 : f32 to vector<1x128xf32>
    %46 = arith.mulf %45, %44 : vector<1x128xf32>
    %cst_38 = arith.constant 0.00999999977 : f32
    %47 = vector.broadcast %cst_38 : f32 to vector<1x128xf32>
    %48 = arith.addf %47, %46 : vector<1x128xf32>
    %49 = tpu.iota {dimensions = array<i32: 1>} : vector<1x128xi32>
    %c64_i32 = arith.constant 64 : i32
    %50 = vector.broadcast %c64_i32 : i32 to vector<1x128xi32>
    %51 = arith.cmpi sge, %49, %50 : vector<1x128xi32>
    %52 = arith.select %51, %48, %37 : vector<1x128xi1>, vector<1x128xf32>
    %c0_39 = arith.constant 0 : index
    %c0_40 = arith.constant 0 : index
    %c0_41 = arith.constant 0 : index
    %53 = vector.load %arg14[%c0_39, %c0_40, %c0_41] : memref<1x1x128xf32, #tpu.memory_space<vmem>>, vector<1x1x128xf32>
    %54 = vector.shape_cast %53 : vector<1x1x128xf32> to vector<1x128xf32>
    %55 = vector.shape_cast %52 : vector<1x128xf32> to vector<1x1x128xf32>
    tpu.vector_store %arg14[%c0_39, %c0_40, %c0_41], %55 {strides = array<i32>} : memref<1x1x128xf32, #tpu.memory_space<vmem>>, vector<1x1x128xf32>,
    return
  }
  func.func @transform_0(%arg0: i32) -> (i32, i32) {
    %c0_i32 = arith.constant 0 : i32
    %c0_i32_0 = arith.constant 0 : i32
    return %arg0, %c0_i32 : i32, i32
  }
  func.func @transform_1(%arg0: i32) -> (i32, i32) {
    %c0_i32 = arith.constant 0 : i32
    %c0_i32_0 = arith.constant 0 : i32
    return %arg0, %c0_i32 : i32, i32
  }
  func.func @transform_2(%arg0: i32) -> (i32, i32) {
    %c0_i32 = arith.constant 0 : i32
    %c0_i32_0 = arith.constant 0 : i32
    %c0_i32_1 = arith.constant 0 : i32
    return %c0_i32, %c0_i32_0 : i32, i32
  }
  func.func @transform_3(%arg0: i32) -> (i32, i32) {
    %c0_i32 = arith.constant 0 : i32
    %c0_i32_0 = arith.constant 0 : i32
    %c0_i32_1 = arith.constant 0 : i32
    return %c0_i32, %c0_i32_0 : i32, i32
  }
  func.func @transform_4(%arg0: i32) -> (i32, i32) {
    %c0_i32 = arith.constant 0 : i32
    %c0_i32_0 = arith.constant 0 : i32
    %c0_i32_1 = arith.constant 0 : i32
    return %c0_i32, %c0_i32_0 : i32, i32
  }
  func.func @transform_5(%arg0: i32) -> (i32, i32) {
    %c0_i32 = arith.constant 0 : i32
    %c0_i32_0 = arith.constant 0 : i32
    %c0_i32_1 = arith.constant 0 : i32
    return %c0_i32, %c0_i32_0 : i32, i32
  }
  func.func @transform_6(%arg0: i32) -> (i32, i32) {
    %c0_i32 = arith.constant 0 : i32
    %c0_i32_0 = arith.constant 0 : i32
    %c0_i32_1 = arith.constant 0 : i32
    return %c0_i32, %c0_i32_0 : i32, i32
  }
  func.func @transform_7(%arg0: i32) -> (i32, i32) {
    %c0_i32 = arith.constant 0 : i32
    %c0_i32_0 = arith.constant 0 : i32
    %c0_i32_1 = arith.constant 0 : i32
    return %c0_i32, %c0_i32_0 : i32, i32
  }
  func.func @transform_8(%arg0: i32) -> (i32, i32) {
    %c0_i32 = arith.constant 0 : i32
    %c0_i32_0 = arith.constant 0 : i32
    %c0_i32_1 = arith.constant 0 : i32
    return %c0_i32, %c0_i32_0 : i32, i32
  }
  func.func @transform_9(%arg0: i32) -> (i32, i32) {
    %c0_i32 = arith.constant 0 : i32
    %c0_i32_0 = arith.constant 0 : i32
    %c0_i32_1 = arith.constant 0 : i32
    return %c0_i32, %c0_i32_0 : i32, i32
  }
  func.func @transform_10(%arg0: i32) -> (i32, i32) {
    %c0_i32 = arith.constant 0 : i32
    %c0_i32_0 = arith.constant 0 : i32
    %c0_i32_1 = arith.constant 0 : i32
    return %c0_i32, %c0_i32_0 : i32, i32
  }
  func.func @transform_11(%arg0: i32) -> (i32, i32) {
    %c0_i32 = arith.constant 0 : i32
    %c0_i32_0 = arith.constant 0 : i32
    %c0_i32_1 = arith.constant 0 : i32
    return %c0_i32, %c0_i32_0 : i32, i32
  }
  func.func @transform_12(%arg0: i32) -> (i32, i32) {
    %c0_i32 = arith.constant 0 : i32
    %c0_i32_0 = arith.constant 0 : i32
    %c0_i32_1 = arith.constant 0 : i32
    return %c0_i32, %c0_i32_0 : i32, i32
  }
  func.func @transform_13(%arg0: i32) -> (i32, i32, i32) {
    %c0_i32 = arith.constant 0 : i32
    %c0_i32_0 = arith.constant 0 : i32
    %c0_i32_1 = arith.constant 0 : i32
    return %arg0, %c0_i32, %c0_i32_0 : i32, i32, i32
  }
}

</mosaic_0001>

<bundles_post_ra>
// kernel: tpu_custom_call.1
= control target key start
LH: loop header
LB: loop body
LE: loop exit
PB: predicated region body
PF: predicated region fallthrough
CT: control target
= control target key end

     0   :  { %18 = vsyncpa [#allocation3], 0  ;;  %s2044_s0 = inlined_call_operand.vmem [shape: f32[16,3], index: 0, kind: input, shape index: {}]   ;;  %s2045_s1 = inlined_call_operand.vmem [shape: f32[16,1], index: 1, kind: input, shape index: {}]   ;;  %s2046_s2 = inlined_call_operand.vmem [shape: f32[3,128], index: 2, kind: input, shape index: {}]   ;;  %s2047_s3 = inlined_call_operand.vmem [shape: f32[1,128], index: 3, kind: input, shape index: {}]   ;;  %s2048_s4 = inlined_call_operand.vmem [shape: f32[1,128], index: 4, kind: input, shape index: {}]   ;;  %s2049_s5 = inlined_call_operand.hbm [shape: f32[128,128], index: 5, kind: input, shape index: {}]   ;;  %s2050_s6 = inlined_call_operand.vmem [shape: f32[1,128], index: 6, kind: input, shape index: {}]   ;;  %s2051_s7 = inlined_call_operand.hbm [shape: f32[128,128], index: 7, kind: input, shape index: {}]   ;;  %s2052_s8 = inlined_call_operand.vmem [shape: f32[1,128], index: 8, kind: input, shape index: {}]   ;;  %s2053_s9 = inlined_call_operand.hbm [shape: f32[128,128], index: 9, kind: input, shape index: {}]   ;;  %s2054_s10 = inlined_call_operand.vmem [shape: f32[1,128], index: 10, kind: input, shape index: {}]   ;;  %s2055_s11 = inlined_call_operand.hbm [shape: f32[128,128], index: 11, kind: input, shape index: {}]   ;;  %s2056_s12 = inlined_call_operand.vmem [shape: f32[1,128], index: 12, kind: input, shape index: {}]   ;;  %s2057_s13 = inlined_call_operand.hbm [shape: f32[2,1,128], index: 13, kind: output, shape index: {}]  }
   0x1   :  { %19 = vsyncpa [#allocation6], 0 }
   0x2   :  { %20 = vsyncpa [#allocation9], 0 }
   0x3   :  { %21 = vsyncpa [#allocation4], 0 }
   0x4   :  { %23 = vsyncpa [#allocation4 + $0x1], 0  ;;  %s1776_s25 = smov 0   ;;  %s1778_s26 = smov 0  }
   0x5   :  { %s1780_s27 = smov 0   ;;  %s1782_s28 = smov 0  }
   0x6 LB: > { %2062 = sst [smem:[#allocation15_spill]] %s1691_s27  ;;  %s1797_s29 = sadd.s32 4294967295, %s1695_s28   ;;  %s1695_s28 = sphi %s1782_s28, %s2071_s28   ;;  %s1691_s27 = sphi %s1780_s27, %s2073_s27   ;;  %s1687_s26 = sphi %s1778_s26, %s2075_s26   ;;  %s1683_s25 = sphi %s1776_s25, %s2074_s25  }
   0x7   : > { %s1184_s30 = sadd.s32 4294967294, %s1695_s28   ;;  %s1801_s14 = sadd.s32 1, %s1695_s28  }
   0x8   : > { %2063 = sst [smem:[#allocation16_spill]] %s1801_s14  ;;  %s319_s15 = sadd.s32 1, %s1691_s27 }
   0x9   : > { %s316_s16 = ssub.s32 %s1695_s28, %s1801_s14  ;;  %p329_p0 = scmp.ne.s32.totalorder %s1691_s27, %s1687_s26 }
   0xa   : > { %p317_p1 = scmp.eq.s32.totalorder %s316_s16, 0  ;;  %p330_p2 = scmp.eq.s32.totalorder %s1797_s29, 1 }
   0xb   : > { %p335_p3 = scmp.ne.s32.totalorder %s1687_s26, %s1683_s25  ;;  %p336_p4 = scmp.eq.s32.totalorder %s1184_s30, 1 }
   0xc   : > { %s1812_s17 = scalar_select %p317_p1, %s1691_s27, %s319_s15  }
   0xd   : > { %p1814_p5 = por %p330_p2, %p329_p0  ;;  %p1818_p6 = por %p336_p4, %p335_p3 }
   0xe   : > { %2064 = sst [smem:[#allocation17_spill]] %s1812_s17  ;;  %p1185_p7 = scmp.ge.s32.totalorder %s1695_s28, 1 }
   0xf   : > { %s2066_s19 = scalar_select %p1818_p6, 1, 0 }
  0x10   : > { %p343_p8 = scmp.lt.s32.totalorder %s1695_s28, 3  ;;  %p1466_p9 = scmp.eq.s32.totalorder %s1797_s29, 0 }
  0x11   : > { %2067 = sst [smem:[#allocation18_spill]] %s2066_s19  ;;  %s1697_s21 = smov [#allocation5]  }
  0x12   : > { %p1825_p10 = pnand %p1185_p7, %p343_p8  ;;  %s380_s22 = sshll.u32 %s1697_s21, 4  ;;  %s381_s22 = int_to_ptr.vmem [resolvable:$true] %s380_s22 }
  0x13   : > { %s1698_s24 = smov [#allocation2]   ;;  %s1699_s15 = smov [#allocation7]  }
  0x14   : > { %p1449_p11 = pneg %p1825_p10  ;;  %s364_s30 = sshll.u32 %s1698_s24, 4  ;;  %s365_s30 = int_to_ptr.vmem [resolvable:$true] %s364_s30 }
  0x15   : > { %s396_s16 = sshll.u32 %s1699_s15, 4  ;;  %s1530_s17 = scalar_lea.vmem %s381_s22, 2048  ;;  %s397_s16 = int_to_ptr.vmem [resolvable:$true] %s396_s16 }
  0x16   : > { %p1833_p12 = pnand %p1466_p9, %p1449_p11  ;;  %p1531_p0 = scmp.ne.s32.totalorder %s381_s22, %s1530_s17 }
  0x17   : > { %p1538_p3 = scmp.lt.s32.totalorder %s381_s22, %s381_s22  ;;  %p1539_p4 = scmp.lt.s32.totalorder %s1530_s17, %s1530_s17 }
  0x18   : > { %p1521_p13 = pneg %p1833_p12 }
  0x19   : > { %p1540_p7 = por %p1539_p4, %p1538_p3 }
  0x1a   : > { %p1533_p1 = pnand %p1531_p0, %p1521_p13 }
  0x1c   : > { %p1534_p2 = pneg %p1533_p1 }
  0x1e   : > { %p1541_p8 = pnand %p1540_p7, %p1534_p2 }
  0x20   : > { %1544 = shalt.err (!%p1541_p8)
}
  0x21   : > { %s1700_s21 = smov 128   ;;  %s1701_s24 = smov 8  }
  0x22   : > { %1455 = dma.hbm_to_vmem [thread:$0]  (!%p1833_p12), %s2051_s7, 2048, %s381_s22, [#allocation6], %s1700_s21, %s1700_s21, %s1701_s24  }
  0x23   : > { %s1556_s14 = scalar_lea.vmem %s365_s30, 2048  ;;  %p1564_p2 = scmp.lt.s32.totalorder %s365_s30, %s365_s30 }
  0x24   : > { %p1557_p11 = scmp.ne.s32.totalorder %s365_s30, %s1556_s14  ;;  %p1565_p3 = scmp.lt.s32.totalorder %s1556_s14, %s1556_s14 }
  0x26   : > { %p1559_p0 = pnand %p1557_p11, %p1521_p13  ;;  %p1566_p4 = por %p1565_p3, %p1564_p2 }
  0x28   : > { %p1560_p1 = pneg %p1559_p0 }
  0x2a   : > { %p1567_p7 = pnand %p1566_p4, %p1560_p1 }
  0x2c   : > { %1570 = shalt.err (!%p1567_p7)
}
  0x2d   : > { %1452 = dma.hbm_to_vmem [thread:$0]  (!%p1833_p12), %s2049_s5, 2048, %s365_s30, [#allocation3], %s1700_s21, %s1700_s21, %s1701_s24  }
  0x2e   : > { %s1582_s27 = scalar_lea.vmem %s397_s16, 2048  ;;  %p1590_p2 = scmp.lt.s32.totalorder %s397_s16, %s397_s16 }
  0x2f   : > { %p1583_p8 = scmp.ne.s32.totalorder %s397_s16, %s1582_s27  ;;  %p1591_p1 = scmp.lt.s32.totalorder %s1582_s27, %s1582_s27 }
  0x31   : > { %p1585_p11 = pnand %p1583_p8, %p1521_p13  ;;  %p1592_p3 = por %p1591_p1, %p1590_p2 }
  0x33   : > { %p1586_p0 = pneg %p1585_p11 }
  0x35   : > { %p1593_p4 = pnand %p1592_p3, %p1586_p0 }
  0x37   : > { %1596 = shalt.err (!%p1593_p4)
}
  0x38   : > { %1458 = dma.hbm_to_vmem [thread:$0]  (!%p1833_p12), %s2053_s9, 2048, %s397_s16, [#allocation6], %s1700_s21, %s1700_s21, %s1701_s24  }
  0x39   : > { %s1702_s22 = smov [#allocation8]  }
  0x3a   : > { %s412_s30 = sshll.u32 %s1702_s22, 4  ;;  %s413_s30 = int_to_ptr.vmem [resolvable:$true] %s412_s30 }
  0x3b   : > { %s1608_s15 = scalar_lea.vmem %s413_s30, 2048  ;;  %p1616_p0 = scmp.lt.s32.totalorder %s413_s30, %s413_s30 }
  0x3c   : > { %p1609_p7 = scmp.ne.s32.totalorder %s413_s30, %s1608_s15  ;;  %p1617_p2 = scmp.lt.s32.totalorder %s1608_s15, %s1608_s15 }
  0x3e   : > { %p1611_p8 = pnand %p1609_p7, %p1521_p13  ;;  %p1618_p1 = por %p1617_p2, %p1616_p0 }
  0x40   : > { %p1612_p11 = pneg %p1611_p8 }
  0x42   : > { %p1619_p3 = pnand %p1618_p1, %p1612_p11 }
  0x44   : > { %1622 = shalt.err (!%p1619_p3)
}
  0x45   : > { %1461 = dma.hbm_to_vmem [thread:$0]  (!%p1833_p12), %s2055_s11, 2048, %s413_s30, [#allocation9], %s1700_s21, %s1700_s21, %s1701_s24  }
  0x46   : > { %445 = sbr.rel (%p1825_p10) target bundleno = 1137 (0x471), region = 72 }
  0x4b   : > { %1666 = dma.done.wait (%p1466_p9), [#allocation3], 2048  }
  0x4c   : > { %1668 = vsyncadd (%p1466_p9), [#allocation3], 4294965248 }
  0x4d   : > { %1670 = dma.done.wait (%p1466_p9), [#allocation6], 4096  }
  0x4e   : > { %1672 = vsyncadd (%p1466_p9), [#allocation6], 4294963200 }
  0x4f   : > { %1674 = dma.done.wait (%p1466_p9), [#allocation9], 2048  }
  0x50   : > { %1676 = vsyncadd (%p1466_p9), [#allocation9], 4294965248  ;;  %v1703_v0 = vmov 0.0   ;;  %p503_p10 = scmp.lt.s32.totalorder %s1797_s29, 1  ;;  %vm1704_vm0 = vmmov 0   ;;  %vm519_vm1 = vcmask 1040384  }
  0x51   : > { %1281 = vmatprep.subr.mxu0 %v1703_v0  ;;  %1286 = vmatprep.subr.mxu1 %v1703_v0  ;;  %vm597_vm2 = vcmask 1042432   ;;  %vm515_vm3 = vcmask 7168   ;;  %vm593_vm4 = vcmask 23552   ;;  %v514_v1 = vld [vmem:[%s2047_s3] sm:$0x1]  ;;  %v695_v5 = vld [vmem:[#allocation2 + $0x78] sm:$0xff] }
  0x52   : > { %1283 = vmatprep.mubr.msk.f32.mxu0 %vm1704_vm0, %v1703_v0  ;;  %1288 = vmatprep.mubr.msk.f32.mxu1 %vm1704_vm0, %v1703_v0  ;;  %s504_s20 = scalar_select %p503_p10, %s1797_s29, 1  ;;  %v513_v2 = vld [vmem:[%s2046_s2] sm:$0x7]  ;;  %v694_v6 = vld [vmem:[#allocation2 + $0x70] sm:$0xff]  ;;  %v693_v7 = vld [vmem:[#allocation2 + $0x68] sm:$0xff] }
  0x53   : > { %1282 = vmatpush3.msk.msra.mxu0 %vm519_vm1, %v514_v1  ;;  %1287 = vmatpush3.msk.msra.mxu1 %vm597_vm2, %v513_v2  ;;  %v692_v8 = vld [vmem:[#allocation2 + $0x60] sm:$0xff]  ;;  %v691_v9 = vld [vmem:[#allocation2 + $0x58] sm:$0xff]  ;;  %v690_v10 = vld [vmem:[#allocation2 + $0x50] sm:$0xff]  ;;  %s501_s16 = sand.u32 1, %s1687_s26   ;;  %s1206_s17 = sshll.u32 %s1797_s29, 4 }
  0x54   : > { %s1196_s23 = sshll.u32 %s504_s20, 3  ;;  %1291 = vmatprep.subr.mxu0 %v1703_v0  ;;  %1326 = vmatprep.subr.mxu1 %v1703_v0  ;;  %v689_v11 = vld [vmem:[#allocation2 + $0x48] sm:$0xff]  ;;  %v688_v12 = vld [vmem:[#allocation2 + $0x40] sm:$0xff]  ;;  %v687_v13 = vld [vmem:[#allocation2 + $0x38] sm:$0xff]  ;;  %s502_s20 = scalar_lea.vmem [#allocation10], %s501_s16 }
  0x55   : > { %s510_s27 = scalar_lea.vmem %s2045_s1, %s1196_s23  ;;  %s506_s22 = scalar_lea.vmem %s2044_s0, %s1196_s23  ;;  %v686_v14 = vld [vmem:[#allocation2 + $0x30] sm:$0xff]  ;;  %v685_v15 = vld [vmem:[#allocation2 + $0x28] sm:$0xff]  ;;  %v684_v16 = vld [vmem:[#allocation2 + $0x20] sm:$0xff] }
  0x56   : > { %v512_v3 = vld [vmem:[%s510_s27] sm:$0xff]  ;;  %v683_v17 = vld [vmem:[#allocation2 + $0x18] sm:$0xff]  ;;  %v682_v18 = vld [vmem:[#allocation2 + $0x10] sm:$0xff]  ;;  %s1076_s23 = sshll.u32 %s502_s20, 4  ;;  %s2009_s27 = scalar_lea.hbm %s2057_s13, %s1206_s17  ;;  %s1077_s23 = int_to_ptr.vmem [resolvable:$true] %s1076_s23 }
  0x57   : > { %v511_v4 = vld [vmem:[%s506_s22] sm:$0xff]  ;;  %1284 = vmatmul.mubr.msk.f32.vlgmr.msra.gmra.mxu0 %vm515_vm3, %v512_v3  ;;  %v681_v19 = vld [vmem:[#allocation2 + $0x8] sm:$0xff]  ;;  %v789_v21 = vld [vmem:[#allocation5 + $0x78] sm:$0xff]  ;;  %s1064_s14 = scalar_lea.sflag [#allocation4], %s501_s16  ;;  %s1623_s19 = scalar_lea.vmem %s1077_s23, 16 }
  0x58   : > { %1289 = vmatmul.mubr.msk.f32.vlgmr.msra.gmra.mxu1 %vm593_vm4, %v511_v4  ;;  %1323 = vmatprep.mubr.msk.f32.mxu0 %vm1704_vm0, %v1703_v0  ;;  %v680_v20 = vld [vmem:[#allocation2] sm:$0xff]  ;;  %v788_v22 = vld [vmem:[#allocation5 + $0x70] sm:$0xff]  ;;  %v787_v23 = vld [vmem:[#allocation5 + $0x68] sm:$0xff]  ;;  %p1624_p9 = scmp.ne.s32.totalorder %s1077_s23, %s1623_s19  ;;  %s1705_s22 = smov [#allocation10]  }
  0x59   : > { %1292 = vmatpush3.msra.mxu0 %v695_v5  ;;  %1358 = vmatprep.mubr.msk.f32.mxu1 %vm1704_vm0, %v1703_v0  ;;  %v786_v24 = vld [vmem:[#allocation5 + $0x60] sm:$0xff]  ;;  %v785_v25 = vld [vmem:[#allocation5 + $0x58] sm:$0xff]  ;;  %v784_v26 = vld [vmem:[#allocation5 + $0x50] sm:$0xff]  ;;  %s1627_s29 = sshll.u32 %s1705_s22, 4  ;;  %s1628_s29 = int_to_ptr.vmem [resolvable:$false] %s1627_s29 }
  0x5a   : > { %1293 = vmatprep.subr.mxu0 %v1703_v0  ;;  %1327 = vmatpush3.msra.mxu1 %v789_v21  ;;  %v783_v27 = vld [vmem:[#allocation5 + $0x48] sm:$0xff]  ;;  %v782_v28 = vld [vmem:[#allocation5 + $0x40] sm:$0xff]  ;;  %v781_v29 = vld [vmem:[#allocation5 + $0x38] sm:$0xff]  ;;  %p1625_p12 = pnand %p1624_p9, %p1814_p5  ;;  %s1629_s30 = scalar_lea.vmem %s1628_s29, 32 }
  0x5b   : > { %1294 = vmatpush3.msra.mxu0 %v694_v6  ;;  %1328 = vmatprep.subr.mxu1 %v1703_v0  ;;  %v780_v30 = vld [vmem:[#allocation5 + $0x30] sm:$0xff]  ;;  %v779_v31 = vld [vmem:[#allocation5 + $0x28] sm:$0xff]  ;;  %v778_v32 = vld [vmem:[#allocation5 + $0x20] sm:$0xff]  ;;  %p1630_p4 = scmp.lt.s32.totalorder %s1077_s23, %s1628_s29  ;;  %p1631_p7 = scmp.lt.s32.totalorder %s1629_s30, %s1623_s19 }
  0x5c   : > { %1295 = vmatprep.subr.mxu0 %v1703_v0  ;;  %1329 = vmatpush3.msra.mxu1 %v788_v22  ;;  %v777_v33 = vld [vmem:[#allocation5 + $0x18] sm:$0xff]  ;;  %v1202_v36 = vld [vmem:[%s2048_s4] ss:$0 sm:$0xff]  ;;  %v776_v42 = vld [vmem:[#allocation5 + $0x10] sm:$0xff]  ;;  %p1626_p13 = pneg %p1625_p12 }
  0x5d   : > { %1296 = vmatpush3.msra.mxu0 %v693_v7  ;;  %1330 = vmatprep.subr.mxu1 %v1703_v0  ;;  %v775_v43 = vld [vmem:[#allocation5 + $0x8] sm:$0xff]  ;;  %v774_v44 = vld [vmem:[#allocation5] sm:$0xff]  ;;  %v889_v45 = vld [vmem:[#allocation7 + $0x78] sm:$0xff]  ;;  %p1632_p8 = por %p1631_p7, %p1630_p4 }
  0x5e   : > { %1297 = vmatprep.subr.mxu0 %v1703_v0  ;;  %1331 = vmatpush3.msra.mxu1 %v787_v23  ;;  %v888_v46 = vld [vmem:[#allocation7 + $0x70] sm:$0xff]  ;;  %v887_v47 = vld [vmem:[#allocation7 + $0x68] sm:$0xff]  ;;  %v886_v48 = vld [vmem:[#allocation7 + $0x60] sm:$0xff] }
  0x5f   : > { %1298 = vmatpush3.msra.mxu0 %v692_v8  ;;  %1332 = vmatprep.subr.mxu1 %v1703_v0  ;;  %v885_v49 = vld [vmem:[#allocation7 + $0x58] sm:$0xff]  ;;  %v884_v50 = vld [vmem:[#allocation7 + $0x50] sm:$0xff]  ;;  %v883_v51 = vld [vmem:[#allocation7 + $0x48] sm:$0xff]  ;;  %p1633_p11 = pnand %p1632_p8, %p1626_p13 }
  0x60   : > { %1299 = vmatprep.subr.mxu0 %v1703_v0  ;;  %1333 = vmatpush3.msra.mxu1 %v786_v24  ;;  %v1203_v52 = vld [vmem:[%s2050_s6] ss:$0 sm:$0xff]  ;;  %v881_v58 = vld [vmem:[#allocation7 + $0x38] sm:$0xff]  ;;  %v880_v59 = vld [vmem:[#allocation7 + $0x30] sm:$0xff] }
  0x61   : > { %1300 = vmatpush3.msra.mxu0 %v691_v9  ;;  %1334 = vmatprep.subr.mxu1 %v1703_v0  ;;  %v882_v57 = vld [vmem:[#allocation7 + $0x40] sm:$0xff]  ;;  %v879_v60 = vld [vmem:[#allocation7 + $0x28] sm:$0xff]  ;;  %v877_v62 = vld [vmem:[#allocation7 + $0x18] sm:$0xff] }
  0x62   : > { %1301 = vmatprep.subr.mxu0 %v1703_v0  ;;  %1335 = vmatpush3.msra.mxu1 %v785_v25  ;;  %v878_v61 = vld [vmem:[#allocation7 + $0x20] sm:$0xff]  ;;  %v876_v63 = vld [vmem:[#allocation7 + $0x10] sm:$0xff]  ;;  %v875_v1 = vld [vmem:[#allocation7 + $0x8] sm:$0xff] }
  0x63   : > { %1302 = vmatpush3.msra.mxu0 %v690_v10  ;;  %1336 = vmatprep.subr.mxu1 %v1703_v0  ;;  %v874_v2 = vld [vmem:[#allocation7] sm:$0xff]  ;;  %v977_v3 = vld [vmem:[#allocation8 + $0x78] sm:$0xff]  ;;  %v976_v4 = vld [vmem:[#allocation8 + $0x70] sm:$0xff] }
  0x64   : > { %1303 = vmatprep.subr.mxu0 %v1703_v0  ;;  %1337 = vmatpush3.msra.mxu1 %v784_v26  ;;  %v975_v5 = vld [vmem:[#allocation8 + $0x68] sm:$0xff]  ;;  %v974_v6 = vld [vmem:[#allocation8 + $0x60] sm:$0xff]  ;;  %v973_v7 = vld [vmem:[#allocation8 + $0x58] sm:$0xff] }
  0x65   : > { %1304 = vmatpush3.msra.mxu0 %v689_v11  ;;  %1338 = vmatprep.subr.mxu1 %v1703_v0  ;;  %v972_v8 = vld [vmem:[#allocation8 + $0x50] sm:$0xff]  ;;  %v971_v9 = vld [vmem:[#allocation8 + $0x48] sm:$0xff]  ;;  %v970_v10 = vld [vmem:[#allocation8 + $0x40] sm:$0xff] }
  0x66   : > { %1305 = vmatprep.subr.mxu0 %v1703_v0  ;;  %1339 = vmatpush3.msra.mxu1 %v783_v27  ;;  %v969_v11 = vld [vmem:[#allocation8 + $0x38] sm:$0xff]  ;;  %v964_v27 = vld [vmem:[#allocation8 + $0x10] sm:$0xff] }
  0x67   : > { %1306 = vmatpush3.msra.mxu0 %v688_v12  ;;  %1340 = vmatprep.subr.mxu1 %v1703_v0  ;;  %v968_v12 = vld [vmem:[#allocation8 + $0x30] sm:$0xff] }
  0x68   : > { %1307 = vmatprep.subr.mxu0 %v1703_v0  ;;  %1341 = vmatpush3.msra.mxu1 %v782_v28  ;;  %v963_v28 = vld [vmem:[#allocation8 + $0x8] sm:$0xff] }
  0x69   : > { %1308 = vmatpush3.msra.mxu0 %v687_v13  ;;  %1342 = vmatprep.subr.mxu1 %v1703_v0  ;;  %v967_v13 = vld [vmem:[#allocation8 + $0x28] sm:$0xff] }
  0x6a   : > { %1309 = vmatprep.subr.mxu0 %v1703_v0  ;;  %1343 = vmatpush3.msra.mxu1 %v781_v29  ;;  %v962_v29 = vld [vmem:[#allocation8] sm:$0xff] }
  0x6b   : > { %1310 = vmatpush3.msra.mxu0 %v686_v14  ;;  %1344 = vmatprep.subr.mxu1 %v1703_v0  ;;  %v966_v14 = vld [vmem:[#allocation8 + $0x20] sm:$0xff] }
  0x6c   : > { %1311 = vmatprep.subr.mxu0 %v1703_v0  ;;  %1345 = vmatpush3.msra.mxu1 %v780_v30  ;;  %v890_v30 = vld [vmem:[%s2054_s10] sm:$0x1] }
  0x6d   : > { %1312 = vmatpush3.msra.mxu0 %v685_v15  ;;  %1346 = vmatprep.subr.mxu1 %v1703_v0  ;;  %v965_v15 = vld [vmem:[#allocation8 + $0x18] sm:$0xff] }
  0x6e   : > { %1313 = vmatprep.subr.mxu0 %v1703_v0  ;;  %1347 = vmatpush3.msra.mxu1 %v779_v31 }
  0x6f   : > { %1314 = vmatpush3.msra.mxu0 %v684_v16  ;;  %1348 = vmatprep.subr.mxu1 %v1703_v0  ;;  %v1204_v16 = vld [vmem:[%s2052_s8] ss:$0 sm:$0xff] }
  0x70   : > { %1315 = vmatprep.subr.mxu0 %v1703_v0  ;;  %1349 = vmatpush3.msra.mxu1 %v778_v32 }
  0x71   : > { %1316 = vmatpush3.msra.mxu0 %v683_v17  ;;  %1350 = vmatprep.subr.mxu1 %v1703_v0 }
  0x72   : > { %1317 = vmatprep.subr.mxu0 %v1703_v0  ;;  %1351 = vmatpush3.msra.mxu1 %v777_v33 }
  0x73   : > { %1318 = vmatpush3.msra.mxu0 %v682_v18  ;;  %1352 = vmatprep.subr.mxu1 %v1703_v0 }
  0x74   : > { %1319 = vmatprep.subr.mxu0 %v1703_v0  ;;  %1353 = vmatpush3.msra.mxu1 %v776_v42  ;;  %v1058_v42 = vlaneseq }
  0x75   : > { %1320 = vmatpush3.msra.mxu0 %v681_v19  ;;  %1354 = vmatprep.subr.mxu1 %v1703_v0 }
  0x76   : > { %1321 = vmatprep.subr.mxu0 %v1703_v0  ;;  %1355 = vmatpush3.msra.mxu1 %v775_v43  ;;  %v1059_v43 = vand.u32 127, %v1058_v42 }
  0x77   : > { %1322 = vmatpush3.msra.mxu0 %v680_v20  ;;  %1356 = vmatprep.subr.mxu1 %v1703_v0 }
  0x78   : > { %1361 = vmatprep.subr.mxu0 %v1703_v0  ;;  %1357 = vmatpush3.msra.mxu1 %v774_v44  ;;  %vm1060_vm5 = vcmp.ge.s32.totalorder %v1059_v43, 64 }
  0x79   : > { %1396 = vmatprep.subr.mxu1 %v1703_v0 }
 0x117   : > { %v589_v34 = vpop.f32.mrf.mxu0 }
 0x118   : > { %v667_v35 = vpop.f32.mrf.mxu1 }
 0x119   : > { %v668_v37 = vadd.f32 %v667_v35, %v589_v34  ;;  %v1285_v38 = vpop.f32.mrf.mxu0  ;;  %v978_v35 = vld [vmem:[%s2056_s12] sm:$0x1] }
 0x11a   : > { %v1290_v39 = vpop.f32.mrf.mxu1 }
 0x11b   : > { %v678_v40 = vadd.f32 %v1202_v36, %v668_v37 }
 0x11d   : > { %v679_v41 = vmax.f32 %v678_v40, 0.0 }
 0x11f   : > { %1324 = vmatmul.mubr.f32.vlgmr.msra.gmra.mxu0 %v679_v41 }
 0x120   : > { %1393 = vmatprep.mubr.msk.f32.mxu0 %vm1704_vm0, %v1703_v0  ;;  %1362 = vmatpush3.msra.mxu0 %v889_v45 }
 0x121   : > { %1363 = vmatprep.subr.mxu0 %v1703_v0 }
 0x122   : > { %1364 = vmatpush3.msra.mxu0 %v888_v46 }
 0x123   : > { %1365 = vmatprep.subr.mxu0 %v1703_v0 }
 0x124   : > { %1366 = vmatpush3.msra.mxu0 %v887_v47 }
 0x125   : > { %1367 = vmatprep.subr.mxu0 %v1703_v0 }
 0x126   : > { %1368 = vmatpush3.msra.mxu0 %v886_v48 }
 0x127   : > { %1369 = vmatprep.subr.mxu0 %v1703_v0 }
 0x128   : > { %1370 = vmatpush3.msra.mxu0 %v885_v49 }
 0x129   : > { %1371 = vmatprep.subr.mxu0 %v1703_v0 }
 0x12a   : > { %1372 = vmatpush3.msra.mxu0 %v884_v50 }
 0x12b   : > { %1373 = vmatprep.subr.mxu0 %v1703_v0 }
 0x12c   : > { %1374 = vmatpush3.msra.mxu0 %v883_v51 }
 0x12d   : > { %1375 = vmatprep.subr.mxu0 %v1703_v0 }
 0x12e   : > { %1376 = vmatpush3.msra.mxu0 %v882_v57 }
 0x12f   : > { %1377 = vmatprep.subr.mxu0 %v1703_v0 }
 0x130   : > { %1378 = vmatpush3.msra.mxu0 %v881_v58 }
 0x131   : > { %1379 = vmatprep.subr.mxu0 %v1703_v0 }
 0x132   : > { %1380 = vmatpush3.msra.mxu0 %v880_v59 }
 0x133   : > { %1381 = vmatprep.subr.mxu0 %v1703_v0 }
 0x134   : > { %1382 = vmatpush3.msra.mxu0 %v879_v60 }
 0x135   : > { %1383 = vmatprep.subr.mxu0 %v1703_v0 }
 0x136   : > { %1384 = vmatpush3.msra.mxu0 %v878_v61 }
 0x137   : > { %1385 = vmatprep.subr.mxu0 %v1703_v0 }
 0x138   : > { %1386 = vmatpush3.msra.mxu0 %v877_v62 }
 0x139   : > { %1387 = vmatprep.subr.mxu0 %v1703_v0 }
 0x13a   : > { %1388 = vmatpush3.msra.mxu0 %v876_v63 }
 0x13b   : > { %1389 = vmatprep.subr.mxu0 %v1703_v0 }
 0x13c   : > { %1390 = vmatpush3.msra.mxu0 %v875_v1 }
 0x13d   : > { %1391 = vmatprep.subr.mxu0 %v1703_v0 }
 0x13e   : > { %1392 = vmatpush3.msra.mxu0 %v874_v2 }
 0x1df   : > { %v769_v53 = vpop.f32.mrf.mxu0 }
 0x1e0   : > { %v770_v54 = vadd.f32 %v1203_v52, %v769_v53 }
 0x1e1   : > { %v1325_v55 = vpop.f32.mrf.mxu0 }
 0x1e2   : > { %v773_v56 = vmax.f32 %v770_v54, 0.0 }
 0x1e4   : > { %1359 = vmatmul.mubr.f32.vlgmr.msra.gmra.mxu1 %v773_v56 }
 0x1e5   : > { %1428 = vmatprep.mubr.msk.f32.mxu1 %vm1704_vm0, %v1703_v0  ;;  %1397 = vmatpush3.msra.mxu1 %v977_v3 }
 0x1e6   : > { %1398 = vmatprep.subr.mxu1 %v1703_v0 }
 0x1e7   : > { %1399 = vmatpush3.msra.mxu1 %v976_v4 }
 0x1e8   : > { %1400 = vmatprep.subr.mxu1 %v1703_v0 }
 0x1e9   : > { %1401 = vmatpush3.msra.mxu1 %v975_v5 }
 0x1ea   : > { %1402 = vmatprep.subr.mxu1 %v1703_v0 }
 0x1eb   : > { %1403 = vmatpush3.msra.mxu1 %v974_v6 }
 0x1ec   : > { %1404 = vmatprep.subr.mxu1 %v1703_v0 }
 0x1ed   : > { %1405 = vmatpush3.msra.mxu1 %v973_v7 }
 0x1ee   : > { %1406 = vmatprep.subr.mxu1 %v1703_v0 }
 0x1ef   : > { %1407 = vmatpush3.msra.mxu1 %v972_v8 }
 0x1f0   : > { %1408 = vmatprep.subr.mxu1 %v1703_v0 }
 0x1f1   : > { %1409 = vmatpush3.msra.mxu1 %v971_v9 }
 0x1f2   : > { %1410 = vmatprep.subr.mxu1 %v1703_v0 }
 0x1f3   : > { %1411 = vmatpush3.msra.mxu1 %v970_v10 }
 0x1f4   : > { %1412 = vmatprep.subr.mxu1 %v1703_v0 }
 0x1f5   : > { %1413 = vmatpush3.msra.mxu1 %v969_v11 }
 0x1f6   : > { %1414 = vmatprep.subr.mxu1 %v1703_v0 }
 0x1f7   : > { %1415 = vmatpush3.msra.mxu1 %v968_v12 }
 0x1f8   : > { %1416 = vmatprep.subr.mxu1 %v1703_v0 }
 0x1f9   : > { %1417 = vmatpush3.msra.mxu1 %v967_v13 }
 0x1fa   : > { %1418 = vmatprep.subr.mxu1 %v1703_v0 }
 0x1fb   : > { %1419 = vmatpush3.msra.mxu1 %v966_v14 }
 0x1fc   : > { %1420 = vmatprep.subr.mxu1 %v1703_v0 }
 0x1fd   : > { %1421 = vmatpush3.msra.mxu1 %v965_v15 }
 0x1fe   : > { %1422 = vmatprep.subr.mxu1 %v1703_v0 }
 0x1ff   : > { %1423 = vmatpush3.msra.mxu1 %v964_v27 }
 0x200   : > { %1424 = vmatprep.subr.mxu1 %v1703_v0 }
 0x201   : > { %1425 = vmatpush3.msra.mxu1 %v963_v28 }
 0x202   : > { %1426 = vmatprep.subr.mxu1 %v1703_v0 }
 0x203   : > { %1427 = vmatpush3.msra.mxu1 %v962_v29 }
 0x2a4   : > { %v863_v17 = vpop.f32.mrf.mxu1 }
 0x2a5   : > { %v864_v18 = vadd.f32 %v1204_v16, %v863_v17 }
 0x2a6   : > { %v1360_v19 = vpop.f32.mrf.mxu1 }
 0x2a7   : > { %v867_v20 = vrot.slane %v864_v18, 4 }
 0x2a9   : > { %v868_v21 = vadd.f32 %v867_v20, %v864_v18 }
 0x2ab   : > { %v869_v22 = vrot.slane %v868_v21, 2 }
 0x2ad   : > { %v870_v23 = vadd.f32 %v869_v22, %v868_v21 }
 0x2af   : > { %v871_v24 = vrot.slane %v870_v23, 1 }
 0x2b1   : > { %v872_v25 = vadd.f32 %v871_v24, %v870_v23 }
 0x2b3   : > { %v873_v26 = vmul.f32 0.125, %v872_v25 }
 0x2b5   : > { %1394 = vmatmul.mubr.f32.vlgmr.msra.gmra.mxu0 %v873_v26 }
 0x375   : > { %v957_v31 = vpop.f32.mrf.mxu0 }
 0x376   : > { %v958_v32 = vadd.f32 %v957_v31, %v890_v30 }
 0x377   : > { %v1395_v33 = vpop.f32.mrf.mxu0 }
 0x378   : > { %v961_v34 = vmax.f32 %v958_v32, 0.0 }
 0x37a   : > { %1429 = vmatmul.mubr.f32.vlgmr.msra.gmra.mxu1 %v961_v34 }
 0x43a   : > { %v1045_v36 = vpop.f32.mrf.mxu1 }
 0x43b   : > { %v1046_v37 = vadd.f32 %v1045_v36, %v978_v35 }
 0x43c   : > { %v1430_v0 = vpop.f32.mrf.mxu1 }
 0x43d   : > { %v1205_v38 = vmul.f32 -0.5, %v1046_v37 }
 0x43f   : > { %v1051_v39 = vmul.f32 1.442695, %v1205_v38 }
 0x441   : > { %1515 = vpow2.f32 %v1051_v39 }
 0x44e   : > { %v1516_v40 = vpop.eup %1515 }
 0x44f   : > { %v1053_v41 = vadd.f32 1.0, %v1516_v40 }
 0x451   : > { %1517 = vrcp.f32 %v1053_v41 }
 0x45e   : > { %v1518_v44 = vpop.eup %1517 }
 0x45f   : > { %v1056_v45 = vmul.f32 0.99, %v1518_v44 }
 0x461   : > { %v1057_v46 = vadd.f32 0.01, %v1056_v45 }
 0x463   : > { %v1061_v47 = vsel %vm1060_vm5, %v1057_v46, %v1046_v37 }
 0x464   : > { %1062 = vst [vmem:[%s502_s20] sm:$0x1] %v1061_v47 }
 0x465   : > { %1636 = shalt.err (!%p1633_p11)
}
 0x466   : > { %s1637_s15 = scalar_lea.hbm %s2009_s27, 16  ;;  %s1641_s20 = scalar_lea.hbm %s2057_s13, 32 }
 0x467   : > { %p1638_p0 = scmp.ne.s32.totalorder %s2009_s27, %s1637_s15  ;;  %p1642_p3 = scmp.lt.s32.totalorder %s2009_s27, %s2057_s13 }
 0x468   : > { %p1643_p10 = scmp.lt.s32.totalorder %s1641_s20, %s1637_s15 }
 0x469   : > { %p1639_p2 = pnand %p1638_p0, %p1814_p5 }
 0x46a   : > { %p1644_p9 = por %p1643_p10, %p1642_p3 }
 0x46b   : > { %p1640_p1 = pneg %p1639_p2 }
 0x46d   : > { %p1645_p12 = pnand %p1644_p9, %p1640_p1 }
 0x46f   : > { %1648 = shalt.err (!%p1645_p12)
}
 0x470   : > { %1447 = dma.vmem_to_hbm [thread:$0]  (%p1814_p5), %s1077_s23, 16, %s2009_s27, %s1064_s14  }
 0x471 PF: > { %p1474_p13 = scmp.ge.s32.totalorder %s1695_s28, 2  ;;  %s1088_s22 = sand.u32 1, %s1683_s25  }
 0x472   : > { %s1089_s29 = scalar_lea.sflag [#allocation4], %s1088_s22 }
 0x473   : > { %p1463_p4 = pnand %p1474_p13, %p1818_p6 }
 0x475   : > { %p1464_p7 = pneg %p1463_p4 }
 0x477   : > { %1678 = dma.done.wait (%p1464_p7), %s1089_s29, 16  }
 0x478   : > { %1680 = vsyncadd (%p1464_p7), %s1089_s29, 4294967280  ;;  %s2071_s28 = sld [smem:[#allocation16_spill]]  ;;  %s2074_s25 = smov %s1687_s26 }
 0x479   : > { %s2072_s30 = sld [smem:[#allocation15_spill]] }
 0x47a   : > { %s2073_s27 = sld [smem:[#allocation17_spill]] }
 0x47e   : > { %p26_p8 = scmp.ge.s32.totalorder %s2071_s28, 4  }
 0x47f   : > { %s2075_s26 = smov %s2072_s30 }
 0x480   :  { %28 = sbr.rel (!%p26_p8) target bundleno = 6 (0x6), region = 127 }
 0x485   :  { %1093 = vsyncpa [#allocation3], 1 }
 0x486   :  { %1095 = vsyncpa [#allocation3 + $0x1], 1 }
 0x487   :  { %1096 = vsyncpa [#allocation6], 1 }
 0x488   :  { %1097 = vsyncpa [#allocation9], 1 }
 0x489   :  { %1098 = vsyncpa [#allocation4], 1 }
 0x48a   :  { %1100 = vsyncpa [#allocation4 + $0x1], 1 }

// kernel: tpu_custom_call.1
= control target key start
LH: loop header
LB: loop body
LE: loop exit
PB: predicated region body
PF: predicated region fallthrough
CT: control target
= control target key end

     0   :  { %18 = vsyncpa [#allocation3], 0  ;;  %s2044_s0 = inlined_call_operand.vmem [shape: f32[16,3], index: 0, kind: input, shape index: {}]   ;;  %s2045_s1 = inlined_call_operand.vmem [shape: f32[16,1], index: 1, kind: input, shape index: {}]   ;;  %s2046_s2 = inlined_call_operand.vmem [shape: f32[3,128], index: 2, kind: input, shape index: {}]   ;;  %s2047_s3 = inlined_call_operand.vmem [shape: f32[1,128], index: 3, kind: input, shape index: {}]   ;;  %s2048_s4 = inlined_call_operand.vmem [shape: f32[1,128], index: 4, kind: input, shape index: {}]   ;;  %s2049_s5 = inlined_call_operand.hbm [shape: f32[128,128], index: 5, kind: input, shape index: {}]   ;;  %s2050_s6 = inlined_call_operand.vmem [shape: f32[1,128], index: 6, kind: input, shape index: {}]   ;;  %s2051_s7 = inlined_call_operand.hbm [shape: f32[128,128], index: 7, kind: input, shape index: {}]   ;;  %s2052_s8 = inlined_call_operand.vmem [shape: f32[1,128], index: 8, kind: input, shape index: {}]   ;;  %s2053_s9 = inlined_call_operand.hbm [shape: f32[128,128], index: 9, kind: input, shape index: {}]   ;;  %s2054_s10 = inlined_call_operand.vmem [shape: f32[1,128], index: 10, kind: input, shape index: {}]   ;;  %s2055_s11 = inlined_call_operand.hbm [shape: f32[128,128], index: 11, kind: input, shape index: {}]   ;;  %s2056_s12 = inlined_call_operand.vmem [shape: f32[1,128], index: 12, kind: input, shape index: {}]   ;;  %s2057_s13 = inlined_call_operand.hbm [shape: f32[2,1,128], index: 13, kind: output, shape index: {}]  }
   0x1   :  { %19 = vsyncpa [#allocation6], 0 }
   0x2   :  { %20 = vsyncpa [#allocation9], 0 }
   0x3   :  { %21 = vsyncpa [#allocation4], 0 }
   0x4   :  { %23 = vsyncpa [#allocation4 + $0x1], 0  ;;  %s1776_s25 = smov 0   ;;  %s1778_s26 = smov 0  }
   0x5   :  { %s1780_s27 = smov 0   ;;  %s1782_s28 = smov 0  }
   0x6 LB: > { %2062 = sst [smem:[#allocation15_spill]] %s1691_s27  ;;  %s1797_s29 = sadd.s32 4294967295, %s1695_s28   ;;  %s1695_s28 = sphi %s1782_s28, %s2071_s28   ;;  %s1691_s27 = sphi %s1780_s27, %s2073_s27   ;;  %s1687_s26 = sphi %s1778_s26, %s2075_s26   ;;  %s1683_s25 = sphi %s1776_s25, %s2074_s25  }
   0x7   : > { %s1184_s30 = sadd.s32 4294967294, %s1695_s28   ;;  %s1801_s14 = sadd.s32 1, %s1695_s28  }
   0x8   : > { %2063 = sst [smem:[#allocation16_spill]] %s1801_s14  ;;  %s319_s15 = sadd.s32 1, %s1691_s27 }
   0x9   : > { %s316_s16 = ssub.s32 %s1695_s28, %s1801_s14  ;;  %p329_p0 = scmp.ne.s32.totalorder %s1691_s27, %s1687_s26 }
   0xa   : > { %p317_p1 = scmp.eq.s32.totalorder %s316_s16, 0  ;;  %p330_p2 = scmp.eq.s32.totalorder %s1797_s29, 1 }
   0xb   : > { %p335_p3 = scmp.ne.s32.totalorder %s1687_s26, %s1683_s25  ;;  %p336_p4 = scmp.eq.s32.totalorder %s1184_s30, 1 }
   0xc   : > { %s1812_s17 = scalar_select %p317_p1, %s1691_s27, %s319_s15  }
   0xd   : > { %p1814_p5 = por %p330_p2, %p329_p0  ;;  %p1818_p6 = por %p336_p4, %p335_p3 }
   0xe   : > { %2064 = sst [smem:[#allocation17_spill]] %s1812_s17  ;;  %p1185_p7 = scmp.ge.s32.totalorder %s1695_s28, 1 }
   0xf   : > { %s2066_s19 = scalar_select %p1818_p6, 1, 0 }
  0x10   : > { %p343_p8 = scmp.lt.s32.totalorder %s1695_s28, 3  ;;  %p1466_p9 = scmp.eq.s32.totalorder %s1797_s29, 0 }
  0x11   : > { %2067 = sst [smem:[#allocation18_spill]] %s2066_s19  ;;  %s1697_s21 = smov [#allocation5]  }
  0x12   : > { %p1825_p10 = pnand %p1185_p7, %p343_p8  ;;  %s380_s22 = sshll.u32 %s1697_s21, 4  ;;  %s381_s22 = int_to_ptr.vmem [resolvable:$true] %s380_s22 }
  0x13   : > { %s1698_s24 = smov [#allocation2]   ;;  %s1699_s15 = smov [#allocation7]  }
  0x14   : > { %p1449_p11 = pneg %p1825_p10  ;;  %s364_s30 = sshll.u32 %s1698_s24, 4  ;;  %s365_s30 = int_to_ptr.vmem [resolvable:$true] %s364_s30 }
  0x15   : > { %s396_s16 = sshll.u32 %s1699_s15, 4  ;;  %s1530_s17 = scalar_lea.vmem %s381_s22, 2048  ;;  %s397_s16 = int_to_ptr.vmem [resolvable:$true] %s396_s16 }
  0x16   : > { %p1833_p12 = pnand %p1466_p9, %p1449_p11  ;;  %p1531_p0 = scmp.ne.s32.totalorder %s381_s22, %s1530_s17 }
  0x17   : > { %p1538_p3 = scmp.lt.s32.totalorder %s381_s22, %s381_s22  ;;  %p1539_p4 = scmp.lt.s32.totalorder %s1530_s17, %s1530_s17 }
  0x18   : > { %p1521_p13 = pneg %p1833_p12 }
  0x19   : > { %p1540_p7 = por %p1539_p4, %p1538_p3 }
  0x1a   : > { %p1533_p1 = pnand %p1531_p0, %p1521_p13 }
  0x1c   : > { %p1534_p2 = pneg %p1533_p1 }
  0x1e   : > { %p1541_p8 = pnand %p1540_p7, %p1534_p2 }
  0x20   : > { %1544 = shalt.err (!%p1541_p8)
}
  0x21   : > { %s1700_s21 = smov 128   ;;  %s1701_s24 = smov 8  }
  0x22   : > { %1455 = dma.hbm_to_vmem [thread:$0]  (!%p1833_p12), %s2051_s7, 2048, %s381_s22, [#allocation6], %s1700_s21, %s1700_s21, %s1701_s24  }
  0x23   : > { %s1556_s14 = scalar_lea.vmem %s365_s30, 2048  ;;  %p1564_p2 = scmp.lt.s32.totalorder %s365_s30, %s365_s30 }
  0x24   : > { %p1557_p11 = scmp.ne.s32.totalorder %s365_s30, %s1556_s14  ;;  %p1565_p3 = scmp.lt.s32.totalorder %s1556_s14, %s1556_s14 }
  0x26   : > { %p1559_p0 = pnand %p1557_p11, %p1521_p13  ;;  %p1566_p4 = por %p1565_p3, %p1564_p2 }
  0x28   : > { %p1560_p1 = pneg %p1559_p0 }
  0x2a   : > { %p1567_p7 = pnand %p1566_p4, %p1560_p1 }
  0x2c   : > { %1570 = shalt.err (!%p1567_p7)
}
  0x2d   : > { %1452 = dma.hbm_to_vmem [thread:$0]  (!%p1833_p12), %s2049_s5, 2048, %s365_s30, [#allocation3], %s1700_s21, %s1700_s21, %s1701_s24  }
  0x2e   : > { %s1582_s27 = scalar_lea.vmem %s397_s16, 2048  ;;  %p1590_p2 = scmp.lt.s32.totalorder %s397_s16, %s397_s16 }
  0x2f   : > { %p1583_p8 = scmp.ne.s32.totalorder %s397_s16, %s1582_s27  ;;  %p1591_p1 = scmp.lt.s32.totalorder %s1582_s27, %s1582_s27 }
  0x31   : > { %p1585_p11 = pnand %p1583_p8, %p1521_p13  ;;  %p1592_p3 = por %p1591_p1, %p1590_p2 }
  0x33   : > { %p1586_p0 = pneg %p1585_p11 }
  0x35   : > { %p1593_p4 = pnand %p1592_p3, %p1586_p0 }
  0x37   : > { %1596 = shalt.err (!%p1593_p4)
}
  0x38   : > { %1458 = dma.hbm_to_vmem [thread:$0]  (!%p1833_p12), %s2053_s9, 2048, %s397_s16, [#allocation6], %s1700_s21, %s1700_s21, %s1701_s24  }
  0x39   : > { %s1702_s22 = smov [#allocation8]  }
  0x3a   : > { %s412_s30 = sshll.u32 %s1702_s22, 4  ;;  %s413_s30 = int_to_ptr.vmem [resolvable:$true] %s412_s30 }
  0x3b   : > { %s1608_s15 = scalar_lea.vmem %s413_s30, 2048  ;;  %p1616_p0 = scmp.lt.s32.totalorder %s413_s30, %s413_s30 }
  0x3c   : > { %p1609_p7 = scmp.ne.s32.totalorder %s413_s30, %s1608_s15  ;;  %p1617_p2 = scmp.lt.s32.totalorder %s1608_s15, %s1608_s15 }
  0x3e   : > { %p1611_p8 = pnand %p1609_p7, %p1521_p13  ;;  %p1618_p1 = por %p1617_p2, %p1616_p0 }
  0x40   : > { %p1612_p11 = pneg %p1611_p8 }
  0x42   : > { %p1619_p3 = pnand %p1618_p1, %p1612_p11 }
  0x44   : > { %1622 = shalt.err (!%p1619_p3)
}
  0x45   : > { %1461 = dma.hbm_to_vmem [thread:$0]  (!%p1833_p12), %s2055_s11, 2048, %s413_s30, [#allocation9], %s1700_s21, %s1700_s21, %s1701_s24  }
  0x46   : > { %445 = sbr.rel (%p1825_p10) target bundleno = 1137 (0x471), region = 72 }
  0x4b   : > { %1666 = dma.done.wait (%p1466_p9), [#allocation3], 2048  }
  0x4c   : > { %1668 = vsyncadd (%p1466_p9), [#allocation3], 4294965248 }
  0x4d   : > { %1670 = dma.done.wait (%p1466_p9), [#allocation6], 4096  }
  0x4e   : > { %1672 = vsyncadd (%p1466_p9), [#allocation6], 4294963200 }
  0x4f   : > { %1674 = dma.done.wait (%p1466_p9), [#allocation9], 2048  }
  0x50   : > { %1676 = vsyncadd (%p1466_p9), [#allocation9], 4294965248  ;;  %v1703_v0 = vmov 0.0   ;;  %p503_p10 = scmp.lt.s32.totalorder %s1797_s29, 1  ;;  %vm1704_vm0 = vmmov 0   ;;  %vm519_vm1 = vcmask 1040384  }
  0x51   : > { %1281 = vmatprep.subr.mxu0 %v1703_v0  ;;  %1286 = vmatprep.subr.mxu1 %v1703_v0  ;;  %vm597_vm2 = vcmask 1042432   ;;  %vm515_vm3 = vcmask 7168   ;;  %vm593_vm4 = vcmask 23552   ;;  %v514_v1 = vld [vmem:[%s2047_s3] sm:$0x1]  ;;  %v695_v5 = vld [vmem:[#allocation2 + $0x78] sm:$0xff] }
  0x52   : > { %1283 = vmatprep.mubr.msk.f32.mxu0 %vm1704_vm0, %v1703_v0  ;;  %1288 = vmatprep.mubr.msk.f32.mxu1 %vm1704_vm0, %v1703_v0  ;;  %s504_s20 = scalar_select %p503_p10, %s1797_s29, 1  ;;  %v513_v2 = vld [vmem:[%s2046_s2] sm:$0x7]  ;;  %v694_v6 = vld [vmem:[#allocation2 + $0x70] sm:$0xff]  ;;  %v693_v7 = vld [vmem:[#allocation2 + $0x68] sm:$0xff] }
  0x53   : > { %1282 = vmatpush3.msk.msra.mxu0 %vm519_vm1, %v514_v1  ;;  %1287 = vmatpush3.msk.msra.mxu1 %vm597_vm2, %v513_v2  ;;  %v692_v8 = vld [vmem:[#allocation2 + $0x60] sm:$0xff]  ;;  %v691_v9 = vld [vmem:[#allocation2 + $0x58] sm:$0xff]  ;;  %v690_v10 = vld [vmem:[#allocation2 + $0x50] sm:$0xff]  ;;  %s501_s16 = sand.u32 1, %s1687_s26   ;;  %s1206_s17 = sshll.u32 %s1797_s29, 4 }
  0x54   : > { %s1196_s23 = sshll.u32 %s504_s20, 3  ;;  %1291 = vmatprep.subr.mxu0 %v1703_v0  ;;  %1326 = vmatprep.subr.mxu1 %v1703_v0  ;;  %v689_v11 = vld [vmem:[#allocation2 + $0x48] sm:$0xff]  ;;  %v688_v12 = vld [vmem:[#allocation2 + $0x40] sm:$0xff]  ;;  %v687_v13 = vld [vmem:[#allocation2 + $0x38] sm:$0xff]  ;;  %s502_s20 = scalar_lea.vmem [#allocation10], %s501_s16 }
  0x55   : > { %s510_s27 = scalar_lea.vmem %s2045_s1, %s1196_s23  ;;  %s506_s22 = scalar_lea.vmem %s2044_s0, %s1196_s23  ;;  %v686_v14 = vld [vmem:[#allocation2 + $0x30] sm:$0xff]  ;;  %v685_v15 = vld [vmem:[#allocation2 + $0x28] sm:$0xff]  ;;  %v684_v16 = vld [vmem:[#allocation2 + $0x20] sm:$0xff] }
  0x56   : > { %v512_v3 = vld [vmem:[%s510_s27] sm:$0xff]  ;;  %v683_v17 = vld [vmem:[#allocation2 + $0x18] sm:$0xff]  ;;  %v682_v18 = vld [vmem:[#allocation2 + $0x10] sm:$0xff]  ;;  %s1076_s23 = sshll.u32 %s502_s20, 4  ;;  %s2009_s27 = scalar_lea.hbm %s2057_s13, %s1206_s17  ;;  %s1077_s23 = int_to_ptr.vmem [resolvable:$true] %s1076_s23 }
  0x57   : > { %v511_v4 = vld [vmem:[%s506_s22] sm:$0xff]  ;;  %1284 = vmatmul.mubr.msk.f32.vlgmr.msra.gmra.mxu0 %vm515_vm3, %v512_v3  ;;  %v681_v19 = vld [vmem:[#allocation2 + $0x8] sm:$0xff]  ;;  %v789_v21 = vld [vmem:[#allocation5 + $0x78] sm:$0xff]  ;;  %s1064_s14 = scalar_lea.sflag [#allocation4], %s501_s16  ;;  %s1623_s19 = scalar_lea.vmem %s1077_s23, 16 }
  0x58   : > { %1289 = vmatmul.mubr.msk.f32.vlgmr.msra.gmra.mxu1 %vm593_vm4, %v511_v4  ;;  %1323 = vmatprep.mubr.msk.f32.mxu0 %vm1704_vm0, %v1703_v0  ;;  %v680_v20 = vld [vmem:[#allocation2] sm:$0xff]  ;;  %v788_v22 = vld [vmem:[#allocation5 + $0x70] sm:$0xff]  ;;  %v787_v23 = vld [vmem:[#allocation5 + $0x68] sm:$0xff]  ;;  %p1624_p9 = scmp.ne.s32.totalorder %s1077_s23, %s1623_s19  ;;  %s1705_s22 = smov [#allocation10]  }
  0x59   : > { %1292 = vmatpush3.msra.mxu0 %v695_v5  ;;  %1358 = vmatprep.mubr.msk.f32.mxu1 %vm1704_vm0, %v1703_v0  ;;  %v786_v24 = vld [vmem:[#allocation5 + $0x60] sm:$0xff]  ;;  %v785_v25 = vld [vmem:[#allocation5 + $0x58] sm:$0xff]  ;;  %v784_v26 = vld [vmem:[#allocation5 + $0x50] sm:$0xff]  ;;  %s1627_s29 = sshll.u32 %s1705_s22, 4  ;;  %s1628_s29 = int_to_ptr.vmem [resolvable:$false] %s1627_s29 }
  0x5a   : > { %1293 = vmatprep.subr.mxu0 %v1703_v0  ;;  %1327 = vmatpush3.msra.mxu1 %v789_v21  ;;  %v783_v27 = vld [vmem:[#allocation5 + $0x48] sm:$0xff]  ;;  %v782_v28 = vld [vmem:[#allocation5 + $0x40] sm:$0xff]  ;;  %v781_v29 = vld [vmem:[#allocation5 + $0x38] sm:$0xff]  ;;  %p1625_p12 = pnand %p1624_p9, %p1814_p5  ;;  %s1629_s30 = scalar_lea.vmem %s1628_s29, 32 }
  0x5b   : > { %1294 = vmatpush3.msra.mxu0 %v694_v6  ;;  %1328 = vmatprep.subr.mxu1 %v1703_v0  ;;  %v780_v30 = vld [vmem:[#allocation5 + $0x30] sm:$0xff]  ;;  %v779_v31 = vld [vmem:[#allocation5 + $0x28] sm:$0xff]  ;;  %v778_v32 = vld [vmem:[#allocation5 + $0x20] sm:$0xff]  ;;  %p1630_p4 = scmp.lt.s32.totalorder %s1077_s23, %s1628_s29  ;;  %p1631_p7 = scmp.lt.s32.totalorder %s1629_s30, %s1623_s19 }
  0x5c   : > { %1295 = vmatprep.subr.mxu0 %v1703_v0  ;;  %1329 = vmatpush3.msra.mxu1 %v788_v22  ;;  %v777_v33 = vld [vmem:[#allocation5 + $0x18] sm:$0xff]  ;;  %v1202_v36 = vld [vmem:[%s2048_s4] ss:$0 sm:$0xff]  ;;  %v776_v42 = vld [vmem:[#allocation5 + $0x10] sm:$0xff]  ;;  %p1626_p13 = pneg %p1625_p12 }
  0x5d   : > { %1296 = vmatpush3.msra.mxu0 %v693_v7  ;;  %1330 = vmatprep.subr.mxu1 %v1703_v0  ;;  %v775_v43 = vld [vmem:[#allocation5 + $0x8] sm:$0xff]  ;;  %v774_v44 = vld [vmem:[#allocation5] sm:$0xff]  ;;  %v889_v45 = vld [vmem:[#allocation7 + $0x78] sm:$0xff]  ;;  %p1632_p8 = por %p1631_p7, %p1630_p4 }
  0x5e   : > { %1297 = vmatprep.subr.mxu0 %v1703_v0  ;;  %1331 = vmatpush3.msra.mxu1 %v787_v23  ;;  %v888_v46 = vld [vmem:[#allocation7 + $0x70] sm:$0xff]  ;;  %v887_v47 = vld [vmem:[#allocation7 + $0x68] sm:$0xff]  ;;  %v886_v48 = vld [vmem:[#allocation7 + $0x60] sm:$0xff] }
  0x5f   : > { %1298 = vmatpush3.msra.mxu0 %v692_v8  ;;  %1332 = vmatprep.subr.mxu1 %v1703_v0  ;;  %v885_v49 = vld [vmem:[#allocation7 + $0x58] sm:$0xff]  ;;  %v884_v50 = vld [vmem:[#allocation7 + $0x50] sm:$0xff]  ;;  %v883_v51 = vld [vmem:[#allocation7 + $0x48] sm:$0xff]  ;;  %p1633_p11 = pnand %p1632_p8, %p1626_p13 }
  0x60   : > { %1299 = vmatprep.subr.mxu0 %v1703_v0  ;;  %1333 = vmatpush3.msra.mxu1 %v786_v24  ;;  %v1203_v52 = vld [vmem:[%s2050_s6] ss:$0 sm:$0xff]  ;;  %v881_v58 = vld [vmem:[#allocation7 + $0x38] sm:$0xff]  ;;  %v880_v59 = vld [vmem:[#allocation7 + $0x30] sm:$0xff] }
  0x61   : > { %1300 = vmatpush3.msra.mxu0 %v691_v9  ;;  %1334 = vmatprep.subr.mxu1 %v1703_v0  ;;  %v882_v57 = vld [vmem:[#allocation7 + $0x40] sm:$0xff]  ;;  %v879_v60 = vld [vmem:[#allocation7 + $0x28] sm:$0xff]  ;;  %v877_v62 = vld [vmem:[#allocation7 + $0x18] sm:$0xff] }
  0x62   : > { %1301 = vmatprep.subr.mxu0 %v1703_v0  ;;  %1335 = vmatpush3.msra.mxu1 %v785_v25  ;;  %v878_v61 = vld [vmem:[#allocation7 + $0x20] sm:$0xff]  ;;  %v876_v63 = vld [vmem:[#allocation7 + $0x10] sm:$0xff]  ;;  %v875_v1 = vld [vmem:[#allocation7 + $0x8] sm:$0xff] }
  0x63   : > { %1302 = vmatpush3.msra.mxu0 %v690_v10  ;;  %1336 = vmatprep.subr.mxu1 %v1703_v0  ;;  %v874_v2 = vld [vmem:[#allocation7] sm:$0xff]  ;;  %v977_v3 = vld [vmem:[#allocation8 + $0x78] sm:$0xff]  ;;  %v976_v4 = vld [vmem:[#allocation8 + $0x70] sm:$0xff] }
  0x64   : > { %1303 = vmatprep.subr.mxu0 %v1703_v0  ;;  %1337 = vmatpush3.msra.mxu1 %v784_v26  ;;  %v975_v5 = vld [vmem:[#allocation8 + $0x68] sm:$0xff]  ;;  %v974_v6 = vld [vmem:[#allocation8 + $0x60] sm:$0xff]  ;;  %v973_v7 = vld [vmem:[#allocation8 + $0x58] sm:$0xff] }
  0x65   : > { %1304 = vmatpush3.msra.mxu0 %v689_v11  ;;  %1338 = vmatprep.subr.mxu1 %v1703_v0  ;;  %v972_v8 = vld [vmem:[#allocation8 + $0x50] sm:$0xff]  ;;  %v971_v9 = vld [vmem:[#allocation8 + $0x48] sm:$0xff]  ;;  %v970_v10 = vld [vmem:[#allocation8 + $0x40] sm:$0xff] }
  0x66   : > { %1305 = vmatprep.subr.mxu0 %v1703_v0  ;;  %1339 = vmatpush3.msra.mxu1 %v783_v27  ;;  %v969_v11 = vld [vmem:[#allocation8 + $0x38] sm:$0xff]  ;;  %v964_v27 = vld [vmem:[#allocation8 + $0x10] sm:$0xff] }
  0x67   : > { %1306 = vmatpush3.msra.mxu0 %v688_v12  ;;  %1340 = vmatprep.subr.mxu1 %v1703_v0  ;;  %v968_v12 = vld [vmem:[#allocation8 + $0x30] sm:$0xff] }
  0x68   : > { %1307 = vmatprep.subr.mxu0 %v1703_v0  ;;  %1341 = vmatpush3.msra.mxu1 %v782_v28  ;;  %v963_v28 = vld [vmem:[#allocation8 + $0x8] sm:$0xff] }
  0x69   : > { %1308 = vmatpush3.msra.mxu0 %v687_v13  ;;  %1342 = vmatprep.subr.mxu1 %v1703_v0  ;;  %v967_v13 = vld [vmem:[#allocation8 + $0x28] sm:$0xff] }
  0x6a   : > { %1309 = vmatprep.subr.mxu0 %v1703_v0  ;;  %1343 = vmatpush3.msra.mxu1 %v781_v29  ;;  %v962_v29 = vld [vmem:[#allocation8] sm:$0xff] }
  0x6b   : > { %1310 = vmatpush3.msra.mxu0 %v686_v14  ;;  %1344 = vmatprep.subr.mxu1 %v1703_v0  ;;  %v966_v14 = vld [vmem:[#allocation8 + $0x20] sm:$0xff] }
  0x6c   : > { %1311 = vmatprep.subr.mxu0 %v1703_v0  ;;  %1345 = vmatpush3.msra.mxu1 %v780_v30  ;;  %v890_v30 = vld [vmem:[%s2054_s10] sm:$0x1] }
  0x6d   : > { %1312 = vmatpush3.msra.mxu0 %v685_v15  ;;  %1346 = vmatprep.subr.mxu1 %v1703_v0  ;;  %v965_v15 = vld [vmem:[#allocation8 + $0x18] sm:$0xff] }
  0x6e   : > { %1313 = vmatprep.subr.mxu0 %v1703_v0  ;;  %1347 = vmatpush3.msra.mxu1 %v779_v31 }
  0x6f   : > { %1314 = vmatpush3.msra.mxu0 %v684_v16  ;;  %1348 = vmatprep.subr.mxu1 %v1703_v0  ;;  %v1204_v16 = vld [vmem:[%s2052_s8] ss:$0 sm:$0xff] }
  0x70   : > { %1315 = vmatprep.subr.mxu0 %v1703_v0  ;;  %1349 = vmatpush3.msra.mxu1 %v778_v32 }
  0x71   : > { %1316 = vmatpush3.msra.mxu0 %v683_v17  ;;  %1350 = vmatprep.subr.mxu1 %v1703_v0 }
  0x72   : > { %1317 = vmatprep.subr.mxu0 %v1703_v0  ;;  %1351 = vmatpush3.msra.mxu1 %v777_v33 }
  0x73   : > { %1318 = vmatpush3.msra.mxu0 %v682_v18  ;;  %1352 = vmatprep.subr.mxu1 %v1703_v0 }
  0x74   : > { %1319 = vmatprep.subr.mxu0 %v1703_v0  ;;  %1353 = vmatpush3.msra.mxu1 %v776_v42  ;;  %v1058_v42 = vlaneseq }
  0x75   : > { %1320 = vmatpush3.msra.mxu0 %v681_v19  ;;  %1354 = vmatprep.subr.mxu1 %v1703_v0 }
  0x76   : > { %1321 = vmatprep.subr.mxu0 %v1703_v0  ;;  %1355 = vmatpush3.msra.mxu1 %v775_v43  ;;  %v1059_v43 = vand.u32 127, %v1058_v42 }
  0x77   : > { %1322 = vmatpush3.msra.mxu0 %v680_v20  ;;  %1356 = vmatprep.subr.mxu1 %v1703_v0 }
  0x78   : > { %1361 = vmatprep.subr.mxu0 %v1703_v0  ;;  %1357 = vmatpush3.msra.mxu1 %v774_v44  ;;  %vm1060_vm5 = vcmp.ge.s32.totalorder %v1059_v43, 64 }
  0x79   : > { %1396 = vmatprep.subr.mxu1 %v1703_v0 }
 0x117   : > { %v589_v34 = vpop.f32.mrf.mxu0 }
 0x118   : > { %v667_v35 = vpop.f32.mrf.mxu1 }
 0x119   : > { %v668_v37 = vadd.f32 %v667_v35, %v589_v34  ;;  %v1285_v38 = vpop.f32.mrf.mxu0  ;;  %v978_v35 = vld [vmem:[%s2056_s12] sm:$0x1] }
 0x11a   : > { %v1290_v39 = vpop.f32.mrf.mxu1 }
 0x11b   : > { %v678_v40 = vadd.f32 %v1202_v36, %v668_v37 }
 0x11d   : > { %v679_v41 = vmax.f32 %v678_v40, 0.0 }
 0x11f   : > { %1324 = vmatmul.mubr.f32.vlgmr.msra.gmra.mxu0 %v679_v41 }
 0x120   : > { %1393 = vmatprep.mubr.msk.f32.mxu0 %vm1704_vm0, %v1703_v0  ;;  %1362 = vmatpush3.msra.mxu0 %v889_v45 }
 0x121   : > { %1363 = vmatprep.subr.mxu0 %v1703_v0 }
 0x122   : > { %1364 = vmatpush3.msra.mxu0 %v888_v46 }
 0x123   : > { %1365 = vmatprep.subr.mxu0 %v1703_v0 }
 0x124   : > { %1366 = vmatpush3.msra.mxu0 %v887_v47 }
 0x125   : > { %1367 = vmatprep.subr.mxu0 %v1703_v0 }
 0x126   : > { %1368 = vmatpush3.msra.mxu0 %v886_v48 }
 0x127   : > { %1369 = vmatprep.subr.mxu0 %v1703_v0 }
 0x128   : > { %1370 = vmatpush3.msra.mxu0 %v885_v49 }
 0x129   : > { %1371 = vmatprep.subr.mxu0 %v1703_v0 }
 0x12a   : > { %1372 = vmatpush3.msra.mxu0 %v884_v50 }
 0x12b   : > { %1373 = vmatprep.subr.mxu0 %v1703_v0 }
 0x12c   : > { %1374 = vmatpush3.msra.mxu0 %v883_v51 }
 0x12d   : > { %1375 = vmatprep.subr.mxu0 %v1703_v0 }
 0x12e   : > { %1376 = vmatpush3.msra.mxu0 %v882_v57 }
 0x12f   : > { %1377 = vmatprep.subr.mxu0 %v1703_v0 }
 0x130   : > { %1378 = vmatpush3.msra.mxu0 %v881_v58 }
 0x131   : > { %1379 = vmatprep.subr.mxu0 %v1703_v0 }
 0x132   : > { %1380 = vmatpush3.msra.mxu0 %v880_v59 }
 0x133   : > { %1381 = vmatprep.subr.mxu0 %v1703_v0 }
 0x134   : > { %1382 = vmatpush3.msra.mxu0 %v879_v60 }
 0x135   : > { %1383 = vmatprep.subr.mxu0 %v1703_v0 }
 0x136   : > { %1384 = vmatpush3.msra.mxu0 %v878_v61 }
 0x137   : > { %1385 = vmatprep.subr.mxu0 %v1703_v0 }
 0x138   : > { %1386 = vmatpush3.msra.mxu0 %v877_v62 }
 0x139   : > { %1387 = vmatprep.subr.mxu0 %v1703_v0 }
 0x13a   : > { %1388 = vmatpush3.msra.mxu0 %v876_v63 }
 0x13b   : > { %1389 = vmatprep.subr.mxu0 %v1703_v0 }
 0x13c   : > { %1390 = vmatpush3.msra.mxu0 %v875_v1 }
 0x13d   : > { %1391 = vmatprep.subr.mxu0 %v1703_v0 }
 0x13e   : > { %1392 = vmatpush3.msra.mxu0 %v874_v2 }
 0x1df   : > { %v769_v53 = vpop.f32.mrf.mxu0 }
 0x1e0   : > { %v770_v54 = vadd.f32 %v1203_v52, %v769_v53 }
 0x1e1   : > { %v1325_v55 = vpop.f32.mrf.mxu0 }
 0x1e2   : > { %v773_v56 = vmax.f32 %v770_v54, 0.0 }
 0x1e4   : > { %1359 = vmatmul.mubr.f32.vlgmr.msra.gmra.mxu1 %v773_v56 }
 0x1e5   : > { %1428 = vmatprep.mubr.msk.f32.mxu1 %vm1704_vm0, %v1703_v0  ;;  %1397 = vmatpush3.msra.mxu1 %v977_v3 }
 0x1e6   : > { %1398 = vmatprep.subr.mxu1 %v1703_v0 }
 0x1e7   : > { %1399 = vmatpush3.msra.mxu1 %v976_v4 }
 0x1e8   : > { %1400 = vmatprep.subr.mxu1 %v1703_v0 }
 0x1e9   : > { %1401 = vmatpush3.msra.mxu1 %v975_v5 }
 0x1ea   : > { %1402 = vmatprep.subr.mxu1 %v1703_v0 }
 0x1eb   : > { %1403 = vmatpush3.msra.mxu1 %v974_v6 }
 0x1ec   : > { %1404 = vmatprep.subr.mxu1 %v1703_v0 }
 0x1ed   : > { %1405 = vmatpush3.msra.mxu1 %v973_v7 }
 0x1ee   : > { %1406 = vmatprep.subr.mxu1 %v1703_v0 }
 0x1ef   : > { %1407 = vmatpush3.msra.mxu1 %v972_v8 }
 0x1f0   : > { %1408 = vmatprep.subr.mxu1 %v1703_v0 }
 0x1f1   : > { %1409 = vmatpush3.msra.mxu1 %v971_v9 }
 0x1f2   : > { %1410 = vmatprep.subr.mxu1 %v1703_v0 }
 0x1f3   : > { %1411 = vmatpush3.msra.mxu1 %v970_v10 }
 0x1f4   : > { %1412 = vmatprep.subr.mxu1 %v1703_v0 }
 0x1f5   : > { %1413 = vmatpush3.msra.mxu1 %v969_v11 }
 0x1f6   : > { %1414 = vmatprep.subr.mxu1 %v1703_v0 }
 0x1f7   : > { %1415 = vmatpush3.msra.mxu1 %v968_v12 }
 0x1f8   : > { %1416 = vmatprep.subr.mxu1 %v1703_v0 }
 0x1f9   : > { %1417 = vmatpush3.msra.mxu1 %v967_v13 }
 0x1fa   : > { %1418 = vmatprep.subr.mxu1 %v1703_v0 }
 0x1fb   : > { %1419 = vmatpush3.msra.mxu1 %v966_v14 }
 0x1fc   : > { %1420 = vmatprep.subr.mxu1 %v1703_v0 }
 0x1fd   : > { %1421 = vmatpush3.msra.mxu1 %v965_v15 }
 0x1fe   : > { %1422 = vmatprep.subr.mxu1 %v1703_v0 }
 0x1ff   : > { %1423 = vmatpush3.msra.mxu1 %v964_v27 }
 0x200   : > { %1424 = vmatprep.subr.mxu1 %v1703_v0 }
 0x201   : > { %1425 = vmatpush3.msra.mxu1 %v963_v28 }
 0x202   : > { %1426 = vmatprep.subr.mxu1 %v1703_v0 }
 0x203   : > { %1427 = vmatpush3.msra.mxu1 %v962_v29 }
 0x2a4   : > { %v863_v17 = vpop.f32.mrf.mxu1 }
 0x2a5   : > { %v864_v18 = vadd.f32 %v1204_v16, %v863_v17 }
 0x2a6   : > { %v1360_v19 = vpop.f32.mrf.mxu1 }
 0x2a7   : > { %v867_v20 = vrot.slane %v864_v18, 4 }
 0x2a9   : > { %v868_v21 = vadd.f32 %v867_v20, %v864_v18 }
 0x2ab   : > { %v869_v22 = vrot.slane %v868_v21, 2 }
 0x2ad   : > { %v870_v23 = vadd.f32 %v869_v22, %v868_v21 }
 0x2af   : > { %v871_v24 = vrot.slane %v870_v23, 1 }
 0x2b1   : > { %v872_v25 = vadd.f32 %v871_v24, %v870_v23 }
 0x2b3   : > { %v873_v26 = vmul.f32 0.125, %v872_v25 }
 0x2b5   : > { %1394 = vmatmul.mubr.f32.vlgmr.msra.gmra.mxu0 %v873_v26 }
 0x375   : > { %v957_v31 = vpop.f32.mrf.mxu0 }
 0x376   : > { %v958_v32 = vadd.f32 %v957_v31, %v890_v30 }
 0x377   : > { %v1395_v33 = vpop.f32.mrf.mxu0 }
 0x378   : > { %v961_v34 = vmax.f32 %v958_v32, 0.0 }
 0x37a   : > { %1429 = vmatmul.mubr.f32.vlgmr.msra.gmra.mxu1 %v961_v34 }
 0x43a   : > { %v1045_v36 = vpop.f32.mrf.mxu1 }
 0x43b   : > { %v1046_v37 = vadd.f32 %v1045_v36, %v978_v35 }
 0x43c   : > { %v1430_v0 = vpop.f32.mrf.mxu1 }
 0x43d   : > { %v1205_v38 = vmul.f32 -0.5, %v1046_v37 }
 0x43f   : > { %v1051_v39 = vmul.f32 1.442695, %v1205_v38 }
 0x441   : > { %1515 = vpow2.f32 %v1051_v39 }
 0x44e   : > { %v1516_v40 = vpop.eup %1515 }
 0x44f   : > { %v1053_v41 = vadd.f32 1.0, %v1516_v40 }
 0x451   : > { %1517 = vrcp.f32 %v1053_v41 }
 0x45e   : > { %v1518_v44 = vpop.eup %1517 }
 0x45f   : > { %v1056_v45 = vmul.f32 0.99, %v1518_v44 }
 0x461   : > { %v1057_v46 = vadd.f32 0.01, %v1056_v45 }
 0x463   : > { %v1061_v47 = vsel %vm1060_vm5, %v1057_v46, %v1046_v37 }
 0x464   : > { %1062 = vst [vmem:[%s502_s20] sm:$0x1] %v1061_v47 }
 0x465   : > { %1636 = shalt.err (!%p1633_p11)
}
 0x466   : > { %s1637_s15 = scalar_lea.hbm %s2009_s27, 16  ;;  %s1641_s20 = scalar_lea.hbm %s2057_s13, 32 }
 0x467   : > { %p1638_p0 = scmp.ne.s32.totalorder %s2009_s27, %s1637_s15  ;;  %p1642_p3 = scmp.lt.s32.totalorder %s2009_s27, %s2057_s13 }
 0x468   : > { %p1643_p10 = scmp.lt.s32.totalorder %s1641_s20, %s1637_s15 }
 0x469   : > { %p1639_p2 = pnand %p1638_p0, %p1814_p5 }
 0x46a   : > { %p1644_p9 = por %p1643_p10, %p1642_p3 }
 0x46b   : > { %p1640_p1 = pneg %p1639_p2 }
 0x46d   : > { %p1645_p12 = pnand %p1644_p9, %p1640_p1 }
 0x46f   : > { %1648 = shalt.err (!%p1645_p12)
}
 0x470   : > { %1447 = dma.vmem_to_hbm [thread:$0]  (%p1814_p5), %s1077_s23, 16, %s2009_s27, %s1064_s14  }
 0x471 PF: > { %p1474_p13 = scmp.ge.s32.totalorder %s1695_s28, 2  ;;  %s1088_s22 = sand.u32 1, %s1683_s25  }
 0x472   : > { %s1089_s29 = scalar_lea.sflag [#allocation4], %s1088_s22 }
 0x473   : > { %p1463_p4 = pnand %p1474_p13, %p1818_p6 }
 0x475   : > { %p1464_p7 = pneg %p1463_p4 }
 0x477   : > { %1678 = dma.done.wait (%p1464_p7), %s1089_s29, 16  }
 0x478   : > { %1680 = vsyncadd (%p1464_p7), %s1089_s29, 4294967280  ;;  %s2071_s28 = sld [smem:[#allocation16_spill]]  ;;  %s2074_s25 = smov %s1687_s26 }
 0x479   : > { %s2072_s30 = sld [smem:[#allocation15_spill]] }
 0x47a   : > { %s2073_s27 = sld [smem:[#allocation17_spill]] }
 0x47e   : > { %p26_p8 = scmp.ge.s32.totalorder %s2071_s28, 4  }
 0x47f   : > { %s2075_s26 = smov %s2072_s30 }
 0x480   :  { %28 = sbr.rel (!%p26_p8) target bundleno = 6 (0x6), region = 127 }
 0x485   :  { %1093 = vsyncpa [#allocation3], 1 }
 0x486   :  { %1095 = vsyncpa [#allocation3 + $0x1], 1 }
 0x487   :  { %1096 = vsyncpa [#allocation6], 1 }
 0x488   :  { %1097 = vsyncpa [#allocation9], 1 }
 0x489   :  { %1098 = vsyncpa [#allocation4], 1 }
 0x48a   :  { %1100 = vsyncpa [#allocation4 + $0x1], 1 }

</bundles_post_ra>
